<compile_context>
chip_gen: v5e
topology: v5e:2x2
jax: 0.10.0
libtpu: 0.0.40
codegen_flags: <defaults>
</compile_context>

<pallas_src>
import jax
import jax.numpy as jnp
from jax.experimental import pallas as pl
from jax.experimental.pallas import tpu as pltpu

HIDDEN = 64
INPUT = 64
NCOL = 256            # [ r | z ] = lanes 0..127 (one vreg tile), [ n | pad ] = lanes 128..255


def _sigmoid(x):
    # Explicit sigmoid: exp + reciprocal both lower cleanly on the EUP.
    return 1.0 / (1.0 + jnp.exp(-x))


# ----------------------------------------------------------------------------
# Fused kernel: per time-chunk input projection (one MXU matmul into VMEM) +
# sequential GRU recurrence with an in-kernel fori_loop. Hidden state carried
# across chunks in a VMEM scratch.
# ----------------------------------------------------------------------------
def fused_gru_kernel(x_ref, h0_ref, wih_ref, whh_ref, bsum_ref, bhn_ref,
                     out_ref, h_scratch, gi_scratch):
    # x_ref:     (T*B, 64)   bf16 time-major rows (batch inner) for this chunk
    # h0_ref:    (B, 64)     f32 initial hidden state
    # wih_ref:   (64, 256)   bf16 input weights, gate-packed columns [r|z|n|pad]
    # whh_ref:   (64, 256)   bf16 hidden weights, same packing
    # bsum_ref:  (1, 256)    f32 b_ih + [b_hh_r | b_hh_z | 0 | 0]
    # bhn_ref:   (1, 64)     f32 b_hh of the n gate (must be multiplied by r)
    # out_ref:   (T, B, 64)  f32 hidden states for this chunk (time-major)
    # h_scratch:  VMEM (B, 64)    f32, carried across chunks
    # gi_scratch: VMEM (T*B, 256) f32, chunk input projection
    c = pl.program_id(0)
    T, B = out_ref.shape[0], out_ref.shape[1]

    @pl.when(c == 0)
    def _():
        h_scratch[...] = h0_ref[...]

    # Chunk-wide input projection: one bf16 MXU matmul, f32 accumulate, folded biases.
    gi_scratch[...] = (
        jnp.dot(x_ref[...], wih_ref[...], preferred_element_type=jnp.float32)
        + bsum_ref[...]
    )

    whh = whh_ref[...]                                    # loop-invariant (8 bf16 vregs)
    bhn = jnp.broadcast_to(bhn_ref[...], (B, HIDDEN))     # hoisted broadcast

    # TODO(synk): if the bundle dump shows W_hh re-pushed to the MXU every timestep, latch it
    # with pltpu.matmul_push_rhs once per chunk + matmul_acc_lhs/matmul_pop per step (v5e win).
    def step(t, h):
        gi_t = gi_scratch[pl.ds(t * B, B), :]                               # (B, 256)
        gh = jnp.dot(h.astype(jnp.bfloat16), whh,
                     preferred_element_type=jnp.float32)                    # (B, 256)
        rz = _sigmoid(gi_t[:, 0:2 * HIDDEN] + gh[:, 0:2 * HIDDEN])          # one 128-lane vreg
        r = rz[:, 0:HIDDEN]
        z = rz[:, HIDDEN:2 * HIDDEN]
        n = jnp.tanh(gi_t[:, 2 * HIDDEN:3 * HIDDEN]
                     + r * (gh[:, 2 * HIDDEN:3 * HIDDEN] + bhn))
        h_new = (1.0 - z) * n + z * h
        # TODO(synk): per-step (B,64) store is a masked vst; if it ever shows on the critical
        # path, stage unroll-groups into a wider slab / emit batch-major output directly.
        out_ref[t] = h_new
        return h_new

    unroll = True if T <= 32 else 8
    h_scratch[...] = jax.lax.fori_loop(0, T, step, h_scratch[...], unroll=unroll)


def gru_recurrence(x_rows, h0, w_ih_pad, w_hh_pad, b_sum, b_hn, t_chunk, s_pad, batch):
    n_chunks = s_pad // t_chunk
    rows = t_chunk * batch
    return pl.pallas_call(
        fused_gru_kernel,
        out_shape=jax.ShapeDtypeStruct((s_pad, batch, HIDDEN), jnp.float32),
        grid=(n_chunks,),
        in_specs=[
            pl.BlockSpec((rows, INPUT), lambda c: (c, 0)),
            pl.BlockSpec((batch, HIDDEN), lambda c: (0, 0)),
            pl.BlockSpec((INPUT, NCOL), lambda c: (0, 0)),
            pl.BlockSpec((HIDDEN, NCOL), lambda c: (0, 0)),
            pl.BlockSpec((1, NCOL), lambda c: (0, 0)),
            pl.BlockSpec((1, HIDDEN), lambda c: (0, 0)),
        ],
        out_specs=pl.BlockSpec((t_chunk, batch, HIDDEN), lambda c: (c, 0, 0)),
        scratch_shapes=[
            pltpu.VMEM((batch, HIDDEN), jnp.float32),      # carried hidden state
            pltpu.VMEM((rows, NCOL), jnp.float32),         # chunk input projection
        ],
        compiler_params=pltpu.CompilerParams(
            dimension_semantics=("arbitrary",)),           # hidden state carried across chunks
    )(x_rows, h0, w_ih_pad, w_hh_pad, b_sum, b_hn)


# ----------------------------------------------------------------------------
# Parameter packing: PyTorch GRU weights (gates stacked [r;z;n] along rows) ->
# 256-column gate-packed bf16 layout, biases folded.
# ----------------------------------------------------------------------------
def pack_params(w_ih, w_hh, b_ih, b_hh):
    H = HIDDEN

    def split3(a):
        return a[0:H], a[H:2 * H], a[2 * H:3 * H]

    wir, wiz, win_ = split3(w_ih)        # (64, 64) each
    whr, whz, whn = split3(w_hh)
    bir, biz, bin_ = split3(b_ih)
    bhr, bhz, bhn = split3(b_hh)

    def pack_w(wr, wz, wn):              # -> (in, 256) bf16, cols [r | z | n | 0]
        return jnp.concatenate(
            [wr.T, wz.T, wn.T, jnp.zeros_like(wn.T)], axis=1).astype(jnp.bfloat16)

    w_ih_pad = pack_w(wir, wiz, win_)
    w_hh_pad = pack_w(whr, whz, whn)
    # Fold b_ih fully and the r/z parts of b_hh into the precomputed projection.
    b_sum = jnp.concatenate(
        [bir + bhr, biz + bhz, bin_, jnp.zeros((H,), jnp.float32)]
    ).reshape(1, NCOL).astype(jnp.float32)
    b_hn = bhn.reshape(1, H).astype(jnp.float32)
    return {
        "w_ih_pad": w_ih_pad, "w_hh_pad": w_hh_pad, "b_sum": b_sum, "b_hn": b_hn,
        # raw copies kept only for the pure-JAX reference check
        "w_ih": w_ih, "w_hh": w_hh, "b_ih": b_ih, "b_hh": b_hh,
    }


def init_params(key):
    # PyTorch GRU init: U(-1/sqrt(hidden), 1/sqrt(hidden))
    k = 1.0 / jnp.sqrt(jnp.float32(HIDDEN))
    k1, k2, k3, k4 = jax.random.split(key, 4)
    w_ih = jax.random.uniform(k1, (3 * HIDDEN, INPUT), jnp.float32, -k, k)
    w_hh = jax.random.uniform(k2, (3 * HIDDEN, HIDDEN), jnp.float32, -k, k)
    b_ih = jax.random.uniform(k3, (3 * HIDDEN,), jnp.float32, -k, k)
    b_hh = jax.random.uniform(k4, (3 * HIDDEN,), jnp.float32, -k, k)
    return pack_params(w_ih, w_hh, b_ih, b_hh)


# ----------------------------------------------------------------------------
# Wrapper
# ----------------------------------------------------------------------------
def down_rnn_forward(x, params, h0):
    # x: (batch, 64, seq) -- the PyTorch module's NCL input.
    B, _, S = x.shape
    x_tm = jnp.transpose(x, (2, 0, 1))               # (S, B, 64) time-major, one transpose

    # Time chunk from a VMEM row budget: ~4096 rows keeps gi + x + out chunk blocks at ~7 MiB,
    # comfortably under v7x's 32 MiB scoped default / 64 MiB physical (v5e/v6e have 128 MiB).
    max_rows = 4096
    t_cap = max(8, ((max_rows // B) // 8) * 8)       # multiple of 8 -> (8,128) block rule holds
    if S <= t_cap:
        t_chunk, s_pad = S, S                        # single chunk, blocks equal full extents
    else:
        t_chunk = t_cap
        s_pad = ((S + t_chunk - 1) // t_chunk) * t_chunk
        x_tm = jnp.pad(x_tm, ((0, s_pad - S), (0, 0), (0, 0)))
        # NOTE: padded tail timesteps run through the recurrence and leave a garbage carried
        # hidden state; harmless because only output[:S] is returned (the module drops h_n).

    x_rows = x_tm.reshape(s_pad * B, INPUT).astype(jnp.bfloat16)   # bf16 MXU operand

    out_tm = gru_recurrence(x_rows, h0, params["w_ih_pad"], params["w_hh_pad"],
                            params["b_sum"], params["b_hn"], t_chunk, s_pad, B)

    # TODO(synk): emit batch-major (B, S, 64) directly from the kernel to drop this transpose
    # (one extra HBM pass over the output for long sequences).
    return jnp.transpose(out_tm[:S], (1, 0, 2))      # (batch, seq, 64) == PyTorch `output`


def gru_reference(x_tm, h0, w_ih, w_hh, b_ih, b_hh, matmul_dtype=jnp.float32):
    """Pure-JAX reference matching torch.nn.GRU math; matmul operands cast to matmul_dtype."""
    def mm(a, b):
        return jnp.dot(a.astype(matmul_dtype), b.astype(matmul_dtype),
                       preferred_element_type=jnp.float32)

    def step(h, x_t):
        gi = mm(x_t, w_ih.T) + b_ih
        gh = mm(h, w_hh.T) + b_hh
        i_r, i_z, i_n = jnp.split(gi, 3, axis=-1)
        h_r, h_z, h_n = jnp.split(gh, 3, axis=-1)
        r = jax.nn.sigmoid(i_r + h_r)
        z = jax.nn.sigmoid(i_z + h_z)
        n = jnp.tanh(i_n + r * h_n)
        h_new = (1.0 - z) * n + z * h
        return h_new, h_new

    _, ys = jax.lax.scan(step, h0, x_tm)
    return ys                                        # (S, B, 64)


if __name__ == "__main__":
    batch, seq = 2, 8
    root = jax.random.PRNGKey(0)
    kx, kh, kp = jax.random.split(root, 3)

    # Module input: (batch, 64, seq) -- transposed to (batch, seq, 64) inside forward.
    x = jax.random.normal(kx, (batch, INPUT, seq), jnp.float32)

    # TODO(synk): PyTorch draws h0 with torch.randn each forward (non-deterministic RNG);
    # we use a fixed key so the run is deterministic.
    h0 = jax.random.normal(kh, (batch, HIDDEN), jnp.float32)

    params = init_params(kp)

    out = down_rnn_forward(x, params, h0)
    jax.block_until_ready(out)
    assert out.shape == (batch, seq, HIDDEN)

    # Silent correctness checks.
    x_tm = jnp.transpose(x, (2, 0, 1))
    # (a) tight check vs. a reference that mirrors the kernel's bf16 MXU operands
    ref_bf16 = jnp.transpose(
        gru_reference(x_tm, h0, params["w_ih"], params["w_hh"], params["b_ih"],
                      params["b_hh"], matmul_dtype=jnp.bfloat16), (1, 0, 2))
    assert jnp.allclose(out, ref_bf16, atol=2e-3, rtol=2e-3), "mismatch vs bf16-matched GRU ref"
    # (b) loose check vs. pure-f32 GRU math (bounds bf16 rounding through the recurrence)
    ref_f32 = jnp.transpose(
        gru_reference(x_tm, h0, params["w_ih"], params["w_hh"], params["b_ih"],
                      params["b_hh"], matmul_dtype=jnp.float32), (1, 0, 2))
    assert jnp.allclose(out, ref_f32, atol=5e-2, rtol=5e-2), "mismatch vs f32 GRU reference"

    print("KERNEL_OK")
</pallas_src>

<mosaic_0001>
module attributes {stable_mosaic.version = 11 : i64} {
  func.func @fused_gru_kernel(%arg0: i32, %arg1: memref<16x64xbf16, #tpu.memory_space<vmem>>, %arg2: memref<2x64xf32, #tpu.memory_space<vmem>>, %arg3: memref<64x256xbf16, #tpu.memory_space<vmem>>, %arg4: memref<64x256xbf16, #tpu.memory_space<vmem>>, %arg5: memref<1x256xf32, #tpu.memory_space<vmem>>, %arg6: memref<1x64xf32, #tpu.memory_space<vmem>>, %arg7: memref<8x2x64xf32, #tpu.memory_space<vmem>>, %arg8: memref<2x64xf32, #tpu.memory_space<vmem>>, %arg9: memref<16x256xf32, #tpu.memory_space<vmem>>) attributes {dimension_semantics = [#tpu.dimension_semantics<arbitrary>], iteration_bounds = array<i64: 1>, scalar_prefetch = 0 : i64, scratch_operands = 2 : i64, tpu.core_type = #tpu.core_type<tc>, window_params = [{transform_indices = @transform_0, window_bounds = array<i64: 16, 64>}, {pipeline_mode = #tpu.pipeline_mode<synchronous>, transform_indices = @transform_1, window_bounds = array<i64: 2, 64>}, {pipeline_mode = #tpu.pipeline_mode<synchronous>, transform_indices = @transform_2, window_bounds = array<i64: 64, 256>}, {pipeline_mode = #tpu.pipeline_mode<synchronous>, transform_indices = @transform_3, window_bounds = array<i64: 64, 256>}, {pipeline_mode = #tpu.pipeline_mode<synchronous>, transform_indices = @transform_4, window_bounds = array<i64: 1, 256>}, {pipeline_mode = #tpu.pipeline_mode<synchronous>, transform_indices = @transform_5, window_bounds = array<i64: 1, 64>}, {transform_indices = @transform_6, window_bounds = array<i64: 8, 2, 64>}]} {
    %c0_i32 = arith.constant 0 : i32
    %0 = arith.cmpi eq, %arg0, %c0_i32 : i32
    %1 = arith.extui %0 : i1 to i32
    %c0_i32_0 = arith.constant 0 : i32
    %2 = arith.cmpi ne, %1, %c0_i32_0 : i32
    scf.if %2 {
      %c0_89 = arith.constant 0 : index
      %c0_90 = arith.constant 0 : index
      %272 = vector.load %arg2[%c0_89, %c0_90] : memref<2x64xf32, #tpu.memory_space<vmem>>, vector<2x64xf32>
      %c0_91 = arith.constant 0 : index
      %c0_92 = arith.constant 0 : index
      %273 = vector.load %arg8[%c0_91, %c0_92] : memref<2x64xf32, #tpu.memory_space<vmem>>, vector<2x64xf32>
      tpu.vector_store %arg8[%c0_91, %c0_92], %272 {strides = array<i32>} : memref<2x64xf32, #tpu.memory_space<vmem>>, vector<2x64xf32>,
    } else {
    }
    %c0 = arith.constant 0 : index
    %c0_1 = arith.constant 0 : index
    %3 = vector.load %arg1[%c0, %c0_1] : memref<16x64xbf16, #tpu.memory_space<vmem>>, vector<16x64xbf16>
    %c0_2 = arith.constant 0 : index
    %c0_3 = arith.constant 0 : index
    %4 = vector.load %arg3[%c0_2, %c0_3] : memref<64x256xbf16, #tpu.memory_space<vmem>>, vector<64x256xbf16>
    %cst = arith.constant dense<0.000000e+00> : vector<16x256xf32>
    %5 = tpu.matmul %3, %4, %cst {dimension_numbers = #tpu.dot_dimension_numbers<[1], [0], [0], [1], [0, 0, 1, 1], [], []>} : vector<16x64xbf16>, vector<64x256xbf16>, vector<16x256xf32> -> vector<16x256xf32>
    %c0_4 = arith.constant 0 : index
    %c0_5 = arith.constant 0 : index
    %6 = vector.load %arg5[%c0_4, %c0_5] : memref<1x256xf32, #tpu.memory_space<vmem>>, vector<1x256xf32>
    %7 = vector.broadcast %6 : vector<1x256xf32> to vector<16x256xf32>
    %8 = arith.addf %5, %7 : vector<16x256xf32>
    %c0_6 = arith.constant 0 : index
    %c0_7 = arith.constant 0 : index
    %9 = vector.load %arg9[%c0_6, %c0_7] : memref<16x256xf32, #tpu.memory_space<vmem>>, vector<16x256xf32>
    tpu.vector_store %arg9[%c0_6, %c0_7], %8 {strides = array<i32>} : memref<16x256xf32, #tpu.memory_space<vmem>>, vector<16x256xf32>,
    %c0_8 = arith.constant 0 : index
    %c0_9 = arith.constant 0 : index
    %10 = vector.load %arg4[%c0_8, %c0_9] : memref<64x256xbf16, #tpu.memory_space<vmem>>, vector<64x256xbf16>
    %c0_10 = arith.constant 0 : index
    %c0_11 = arith.constant 0 : index
    %11 = vector.load %arg6[%c0_10, %c0_11] : memref<1x64xf32, #tpu.memory_space<vmem>>, vector<1x64xf32>
    %12 = vector.shape_cast %11 : vector<1x64xf32> to vector<1x64xf32>
    %13 = vector.broadcast %12 : vector<1x64xf32> to vector<2x64xf32>
    %c0_12 = arith.constant 0 : index
    %c0_13 = arith.constant 0 : index
    %14 = vector.load %arg8[%c0_12, %c0_13] : memref<2x64xf32, #tpu.memory_space<vmem>>, vector<2x64xf32>
    %c0_i32_14 = arith.constant 0 : i32
    %c2_i32 = arith.constant 2 : i32
    %15 = arith.muli %c0_i32_14, %c2_i32 : i32
    %16 = arith.index_cast %15 : i32 to index
    %c0_15 = arith.constant 0 : index
    %17 = vector.load %arg9[%16, %c0_15] : memref<16x256xf32, #tpu.memory_space<vmem>>, vector<2x256xf32>
    %18 = arith.truncf %14 : vector<2x64xf32> to vector<2x64xbf16>
    %cst_16 = arith.constant dense<0.000000e+00> : vector<2x256xf32>
    %19 = tpu.matmul %18, %10, %cst_16 {dimension_numbers = #tpu.dot_dimension_numbers<[1], [0], [0], [1], [0, 0, 1, 1], [], []>} : vector<2x64xbf16>, vector<64x256xbf16>, vector<2x256xf32> -> vector<2x256xf32>
    %20 = vector.extract_strided_slice %17 {offsets = [0, 0], sizes = [2, 128], strides = [1, 1]} : vector<2x256xf32> to vector<2x128xf32>
    %21 = vector.extract_strided_slice %19 {offsets = [0, 0], sizes = [2, 128], strides = [1, 1]} : vector<2x256xf32> to vector<2x128xf32>
    %22 = arith.addf %20, %21 : vector<2x128xf32>
    %cst_17 = arith.constant 0.000000e+00 : f32
    %23 = vector.broadcast %cst_17 : f32 to vector<2x128xf32>
    %24 = arith.subf %23, %22 : vector<2x128xf32>
    %25 = math.exp %24 : vector<2x128xf32>
    %cst_18 = arith.constant 1.000000e+00 : f32
    %26 = vector.broadcast %cst_18 : f32 to vector<2x128xf32>
    %27 = arith.addf %26, %25 : vector<2x128xf32>
    %cst_19 = arith.constant 1.000000e+00 : f32
    %28 = vector.broadcast %cst_19 : f32 to vector<2x128xf32>
    %29 = arith.divf %28, %27 : vector<2x128xf32>
    %30 = vector.extract_strided_slice %29 {offsets = [0, 0], sizes = [2, 64], strides = [1, 1]} : vector<2x128xf32> to vector<2x64xf32>
    %31 = vector.extract_strided_slice %29 {offsets = [0, 64], sizes = [2, 64], strides = [1, 1]} : vector<2x128xf32> to vector<2x64xf32>
    %32 = vector.extract_strided_slice %17 {offsets = [0, 128], sizes = [2, 64], strides = [1, 1]} : vector<2x256xf32> to vector<2x64xf32>
    %33 = vector.extract_strided_slice %19 {offsets = [0, 128], sizes = [2, 64], strides = [1, 1]} : vector<2x256xf32> to vector<2x64xf32>
    %34 = arith.addf %33, %13 : vector<2x64xf32>
    %35 = arith.mulf %30, %34 : vector<2x64xf32>
    %36 = arith.addf %32, %35 : vector<2x64xf32>
    %37 = math.tanh %36 : vector<2x64xf32>
    %cst_20 = arith.constant 1.000000e+00 : f32
    %38 = vector.broadcast %cst_20 : f32 to vector<2x64xf32>
    %39 = arith.subf %38, %31 : vector<2x64xf32>
    %40 = arith.mulf %39, %37 : vector<2x64xf32>
    %41 = arith.mulf %31, %14 : vector<2x64xf32>
    %42 = arith.addf %40, %41 : vector<2x64xf32>
    %43 = arith.index_cast %c0_i32_14 : i32 to index
    %c0_21 = arith.constant 0 : index
    %c0_22 = arith.constant 0 : index
    %44 = vector.load %arg7[%43, %c0_21, %c0_22] : memref<8x2x64xf32, #tpu.memory_space<vmem>>, vector<1x2x64xf32>
    %45 = vector.shape_cast %44 : vector<1x2x64xf32> to vector<2x64xf32>
    %46 = vector.shape_cast %42 : vector<2x64xf32> to vector<1x2x64xf32>
    tpu.vector_store %arg7[%43, %c0_21, %c0_22], %46 {strides = array<i32>} : memref<8x2x64xf32, #tpu.memory_space<vmem>>, vector<1x2x64xf32>,
    %c1_i32 = arith.constant 1 : i32
    %c2_i32_23 = arith.constant 2 : i32
    %47 = arith.muli %c1_i32, %c2_i32_23 : i32
    %48 = arith.index_cast %47 : i32 to index
    %c0_24 = arith.constant 0 : index
    %49 = vector.load %arg9[%48, %c0_24] : memref<16x256xf32, #tpu.memory_space<vmem>>, vector<2x256xf32>
    %50 = arith.truncf %42 : vector<2x64xf32> to vector<2x64xbf16>
    %cst_25 = arith.constant dense<0.000000e+00> : vector<2x256xf32>
    %51 = tpu.matmul %50, %10, %cst_25 {dimension_numbers = #tpu.dot_dimension_numbers<[1], [0], [0], [1], [0, 0, 1, 1], [], []>} : vector<2x64xbf16>, vector<64x256xbf16>, vector<2x256xf32> -> vector<2x256xf32>
    %52 = vector.extract_strided_slice %49 {offsets = [0, 0], sizes = [2, 128], strides = [1, 1]} : vector<2x256xf32> to vector<2x128xf32>
    %53 = vector.extract_strided_slice %51 {offsets = [0, 0], sizes = [2, 128], strides = [1, 1]} : vector<2x256xf32> to vector<2x128xf32>
    %54 = arith.addf %52, %53 : vector<2x128xf32>
    %cst_26 = arith.constant 0.000000e+00 : f32
    %55 = vector.broadcast %cst_26 : f32 to vector<2x128xf32>
    %56 = arith.subf %55, %54 : vector<2x128xf32>
    %57 = math.exp %56 : vector<2x128xf32>
    %cst_27 = arith.constant 1.000000e+00 : f32
    %58 = vector.broadcast %cst_27 : f32 to vector<2x128xf32>
    %59 = arith.addf %58, %57 : vector<2x128xf32>
    %cst_28 = arith.constant 1.000000e+00 : f32
    %60 = vector.broadcast %cst_28 : f32 to vector<2x128xf32>
    %61 = arith.divf %60, %59 : vector<2x128xf32>
    %62 = vector.extract_strided_slice %61 {offsets = [0, 0], sizes = [2, 64], strides = [1, 1]} : vector<2x128xf32> to vector<2x64xf32>
    %63 = vector.extract_strided_slice %61 {offsets = [0, 64], sizes = [2, 64], strides = [1, 1]} : vector<2x128xf32> to vector<2x64xf32>
    %64 = vector.extract_strided_slice %49 {offsets = [0, 128], sizes = [2, 64], strides = [1, 1]} : vector<2x256xf32> to vector<2x64xf32>
    %65 = vector.extract_strided_slice %51 {offsets = [0, 128], sizes = [2, 64], strides = [1, 1]} : vector<2x256xf32> to vector<2x64xf32>
    %66 = arith.addf %65, %13 : vector<2x64xf32>
    %67 = arith.mulf %62, %66 : vector<2x64xf32>
    %68 = arith.addf %64, %67 : vector<2x64xf32>
    %69 = math.tanh %68 : vector<2x64xf32>
    %cst_29 = arith.constant 1.000000e+00 : f32
    %70 = vector.broadcast %cst_29 : f32 to vector<2x64xf32>
    %71 = arith.subf %70, %63 : vector<2x64xf32>
    %72 = arith.mulf %71, %69 : vector<2x64xf32>
    %73 = arith.mulf %63, %42 : vector<2x64xf32>
    %74 = arith.addf %72, %73 : vector<2x64xf32>
    %75 = arith.index_cast %c1_i32 : i32 to index
    %c0_30 = arith.constant 0 : index
    %c0_31 = arith.constant 0 : index
    %76 = vector.load %arg7[%75, %c0_30, %c0_31] : memref<8x2x64xf32, #tpu.memory_space<vmem>>, vector<1x2x64xf32>
    %77 = vector.shape_cast %76 : vector<1x2x64xf32> to vector<2x64xf32>
    %78 = vector.shape_cast %74 : vector<2x64xf32> to vector<1x2x64xf32>
    tpu.vector_store %arg7[%75, %c0_30, %c0_31], %78 {strides = array<i32>} : memref<8x2x64xf32, #tpu.memory_space<vmem>>, vector<1x2x64xf32>,
    %c2_i32_32 = arith.constant 2 : i32
    %c2_i32_33 = arith.constant 2 : i32
    %79 = arith.muli %c2_i32_32, %c2_i32_33 : i32
    %80 = arith.index_cast %79 : i32 to index
    %c0_34 = arith.constant 0 : index
    %81 = vector.load %arg9[%80, %c0_34] : memref<16x256xf32, #tpu.memory_space<vmem>>, vector<2x256xf32>
    %82 = arith.truncf %74 : vector<2x64xf32> to vector<2x64xbf16>
    %cst_35 = arith.constant dense<0.000000e+00> : vector<2x256xf32>
    %83 = tpu.matmul %82, %10, %cst_35 {dimension_numbers = #tpu.dot_dimension_numbers<[1], [0], [0], [1], [0, 0, 1, 1], [], []>} : vector<2x64xbf16>, vector<64x256xbf16>, vector<2x256xf32> -> vector<2x256xf32>
    %84 = vector.extract_strided_slice %81 {offsets = [0, 0], sizes = [2, 128], strides = [1, 1]} : vector<2x256xf32> to vector<2x128xf32>
    %85 = vector.extract_strided_slice %83 {offsets = [0, 0], sizes = [2, 128], strides = [1, 1]} : vector<2x256xf32> to vector<2x128xf32>
    %86 = arith.addf %84, %85 : vector<2x128xf32>
    %cst_36 = arith.constant 0.000000e+00 : f32
    %87 = vector.broadcast %cst_36 : f32 to vector<2x128xf32>
    %88 = arith.subf %87, %86 : vector<2x128xf32>
    %89 = math.exp %88 : vector<2x128xf32>
    %cst_37 = arith.constant 1.000000e+00 : f32
    %90 = vector.broadcast %cst_37 : f32 to vector<2x128xf32>
    %91 = arith.addf %90, %89 : vector<2x128xf32>
    %cst_38 = arith.constant 1.000000e+00 : f32
    %92 = vector.broadcast %cst_38 : f32 to vector<2x128xf32>
    %93 = arith.divf %92, %91 : vector<2x128xf32>
    %94 = vector.extract_strided_slice %93 {offsets = [0, 0], sizes = [2, 64], strides = [1, 1]} : vector<2x128xf32> to vector<2x64xf32>
    %95 = vector.extract_strided_slice %93 {offsets = [0, 64], sizes = [2, 64], strides = [1, 1]} : vector<2x128xf32> to vector<2x64xf32>
    %96 = vector.extract_strided_slice %81 {offsets = [0, 128], sizes = [2, 64], strides = [1, 1]} : vector<2x256xf32> to vector<2x64xf32>
    %97 = vector.extract_strided_slice %83 {offsets = [0, 128], sizes = [2, 64], strides = [1, 1]} : vector<2x256xf32> to vector<2x64xf32>
    %98 = arith.addf %97, %13 : vector<2x64xf32>
    %99 = arith.mulf %94, %98 : vector<2x64xf32>
    %100 = arith.addf %96, %99 : vector<2x64xf32>
    %101 = math.tanh %100 : vector<2x64xf32>
    %cst_39 = arith.constant 1.000000e+00 : f32
    %102 = vector.broadcast %cst_39 : f32 to vector<2x64xf32>
    %103 = arith.subf %102, %95 : vector<2x64xf32>
    %104 = arith.mulf %103, %101 : vector<2x64xf32>
    %105 = arith.mulf %95, %74 : vector<2x64xf32>
    %106 = arith.addf %104, %105 : vector<2x64xf32>
    %107 = arith.index_cast %c2_i32_32 : i32 to index
    %c0_40 = arith.constant 0 : index
    %c0_41 = arith.constant 0 : index
    %108 = vector.load %arg7[%107, %c0_40, %c0_41] : memref<8x2x64xf32, #tpu.memory_space<vmem>>, vector<1x2x64xf32>
    %109 = vector.shape_cast %108 : vector<1x2x64xf32> to vector<2x64xf32>
    %110 = vector.shape_cast %106 : vector<2x64xf32> to vector<1x2x64xf32>
    tpu.vector_store %arg7[%107, %c0_40, %c0_41], %110 {strides = array<i32>} : memref<8x2x64xf32, #tpu.memory_space<vmem>>, vector<1x2x64xf32>,
    %c3_i32 = arith.constant 3 : i32
    %c2_i32_42 = arith.constant 2 : i32
    %111 = arith.muli %c3_i32, %c2_i32_42 : i32
    %112 = arith.index_cast %111 : i32 to index
    %c0_43 = arith.constant 0 : index
    %113 = vector.load %arg9[%112, %c0_43] : memref<16x256xf32, #tpu.memory_space<vmem>>, vector<2x256xf32>
    %114 = arith.truncf %106 : vector<2x64xf32> to vector<2x64xbf16>
    %cst_44 = arith.constant dense<0.000000e+00> : vector<2x256xf32>
    %115 = tpu.matmul %114, %10, %cst_44 {dimension_numbers = #tpu.dot_dimension_numbers<[1], [0], [0], [1], [0, 0, 1, 1], [], []>} : vector<2x64xbf16>, vector<64x256xbf16>, vector<2x256xf32> -> vector<2x256xf32>
    %116 = vector.extract_strided_slice %113 {offsets = [0, 0], sizes = [2, 128], strides = [1, 1]} : vector<2x256xf32> to vector<2x128xf32>
    %117 = vector.extract_strided_slice %115 {offsets = [0, 0], sizes = [2, 128], strides = [1, 1]} : vector<2x256xf32> to vector<2x128xf32>
    %118 = arith.addf %116, %117 : vector<2x128xf32>
    %cst_45 = arith.constant 0.000000e+00 : f32
    %119 = vector.broadcast %cst_45 : f32 to vector<2x128xf32>
    %120 = arith.subf %119, %118 : vector<2x128xf32>
    %121 = math.exp %120 : vector<2x128xf32>
    %cst_46 = arith.constant 1.000000e+00 : f32
    %122 = vector.broadcast %cst_46 : f32 to vector<2x128xf32>
    %123 = arith.addf %122, %121 : vector<2x128xf32>
    %cst_47 = arith.constant 1.000000e+00 : f32
    %124 = vector.broadcast %cst_47 : f32 to vector<2x128xf32>
    %125 = arith.divf %124, %123 : vector<2x128xf32>
    %126 = vector.extract_strided_slice %125 {offsets = [0, 0], sizes = [2, 64], strides = [1, 1]} : vector<2x128xf32> to vector<2x64xf32>
    %127 = vector.extract_strided_slice %125 {offsets = [0, 64], sizes = [2, 64], strides = [1, 1]} : vector<2x128xf32> to vector<2x64xf32>
    %128 = vector.extract_strided_slice %113 {offsets = [0, 128], sizes = [2, 64], strides = [1, 1]} : vector<2x256xf32> to vector<2x64xf32>
    %129 = vector.extract_strided_slice %115 {offsets = [0, 128], sizes = [2, 64], strides = [1, 1]} : vector<2x256xf32> to vector<2x64xf32>
    %130 = arith.addf %129, %13 : vector<2x64xf32>
    %131 = arith.mulf %126, %130 : vector<2x64xf32>
    %132 = arith.addf %128, %131 : vector<2x64xf32>
    %133 = math.tanh %132 : vector<2x64xf32>
    %cst_48 = arith.constant 1.000000e+00 : f32
    %134 = vector.broadcast %cst_48 : f32 to vector<2x64xf32>
    %135 = arith.subf %134, %127 : vector<2x64xf32>
    %136 = arith.mulf %135, %133 : vector<2x64xf32>
    %137 = arith.mulf %127, %106 : vector<2x64xf32>
    %138 = arith.addf %136, %137 : vector<2x64xf32>
    %139 = arith.index_cast %c3_i32 : i32 to index
    %c0_49 = arith.constant 0 : index
    %c0_50 = arith.constant 0 : index
    %140 = vector.load %arg7[%139, %c0_49, %c0_50] : memref<8x2x64xf32, #tpu.memory_space<vmem>>, vector<1x2x64xf32>
    %141 = vector.shape_cast %140 : vector<1x2x64xf32> to vector<2x64xf32>
    %142 = vector.shape_cast %138 : vector<2x64xf32> to vector<1x2x64xf32>
    tpu.vector_store %arg7[%139, %c0_49, %c0_50], %142 {strides = array<i32>} : memref<8x2x64xf32, #tpu.memory_space<vmem>>, vector<1x2x64xf32>,
    %c4_i32 = arith.constant 4 : i32
    %c2_i32_51 = arith.constant 2 : i32
    %143 = arith.muli %c4_i32, %c2_i32_51 : i32
    %144 = arith.index_cast %143 : i32 to index
    %c0_52 = arith.constant 0 : index
    %145 = vector.load %arg9[%144, %c0_52] : memref<16x256xf32, #tpu.memory_space<vmem>>, vector<2x256xf32>
    %146 = arith.truncf %138 : vector<2x64xf32> to vector<2x64xbf16>
    %cst_53 = arith.constant dense<0.000000e+00> : vector<2x256xf32>
    %147 = tpu.matmul %146, %10, %cst_53 {dimension_numbers = #tpu.dot_dimension_numbers<[1], [0], [0], [1], [0, 0, 1, 1], [], []>} : vector<2x64xbf16>, vector<64x256xbf16>, vector<2x256xf32> -> vector<2x256xf32>
    %148 = vector.extract_strided_slice %145 {offsets = [0, 0], sizes = [2, 128], strides = [1, 1]} : vector<2x256xf32> to vector<2x128xf32>
    %149 = vector.extract_strided_slice %147 {offsets = [0, 0], sizes = [2, 128], strides = [1, 1]} : vector<2x256xf32> to vector<2x128xf32>
    %150 = arith.addf %148, %149 : vector<2x128xf32>
    %cst_54 = arith.constant 0.000000e+00 : f32
    %151 = vector.broadcast %cst_54 : f32 to vector<2x128xf32>
    %152 = arith.subf %151, %150 : vector<2x128xf32>
    %153 = math.exp %152 : vector<2x128xf32>
    %cst_55 = arith.constant 1.000000e+00 : f32
    %154 = vector.broadcast %cst_55 : f32 to vector<2x128xf32>
    %155 = arith.addf %154, %153 : vector<2x128xf32>
    %cst_56 = arith.constant 1.000000e+00 : f32
    %156 = vector.broadcast %cst_56 : f32 to vector<2x128xf32>
    %157 = arith.divf %156, %155 : vector<2x128xf32>
    %158 = vector.extract_strided_slice %157 {offsets = [0, 0], sizes = [2, 64], strides = [1, 1]} : vector<2x128xf32> to vector<2x64xf32>
    %159 = vector.extract_strided_slice %157 {offsets = [0, 64], sizes = [2, 64], strides = [1, 1]} : vector<2x128xf32> to vector<2x64xf32>
    %160 = vector.extract_strided_slice %145 {offsets = [0, 128], sizes = [2, 64], strides = [1, 1]} : vector<2x256xf32> to vector<2x64xf32>
    %161 = vector.extract_strided_slice %147 {offsets = [0, 128], sizes = [2, 64], strides = [1, 1]} : vector<2x256xf32> to vector<2x64xf32>
    %162 = arith.addf %161, %13 : vector<2x64xf32>
    %163 = arith.mulf %158, %162 : vector<2x64xf32>
    %164 = arith.addf %160, %163 : vector<2x64xf32>
    %165 = math.tanh %164 : vector<2x64xf32>
    %cst_57 = arith.constant 1.000000e+00 : f32
    %166 = vector.broadcast %cst_57 : f32 to vector<2x64xf32>
    %167 = arith.subf %166, %159 : vector<2x64xf32>
    %168 = arith.mulf %167, %165 : vector<2x64xf32>
    %169 = arith.mulf %159, %138 : vector<2x64xf32>
    %170 = arith.addf %168, %169 : vector<2x64xf32>
    %171 = arith.index_cast %c4_i32 : i32 to index
    %c0_58 = arith.constant 0 : index
    %c0_59 = arith.constant 0 : index
    %172 = vector.load %arg7[%171, %c0_58, %c0_59] : memref<8x2x64xf32, #tpu.memory_space<vmem>>, vector<1x2x64xf32>
    %173 = vector.shape_cast %172 : vector<1x2x64xf32> to vector<2x64xf32>
    %174 = vector.shape_cast %170 : vector<2x64xf32> to vector<1x2x64xf32>
    tpu.vector_store %arg7[%171, %c0_58, %c0_59], %174 {strides = array<i32>} : memref<8x2x64xf32, #tpu.memory_space<vmem>>, vector<1x2x64xf32>,
    %c5_i32 = arith.constant 5 : i32
    %c2_i32_60 = arith.constant 2 : i32
    %175 = arith.muli %c5_i32, %c2_i32_60 : i32
    %176 = arith.index_cast %175 : i32 to index
    %c0_61 = arith.constant 0 : index
    %177 = vector.load %arg9[%176, %c0_61] : memref<16x256xf32, #tpu.memory_space<vmem>>, vector<2x256xf32>
    %178 = arith.truncf %170 : vector<2x64xf32> to vector<2x64xbf16>
    %cst_62 = arith.constant dense<0.000000e+00> : vector<2x256xf32>
    %179 = tpu.matmul %178, %10, %cst_62 {dimension_numbers = #tpu.dot_dimension_numbers<[1], [0], [0], [1], [0, 0, 1, 1], [], []>} : vector<2x64xbf16>, vector<64x256xbf16>, vector<2x256xf32> -> vector<2x256xf32>
    %180 = vector.extract_strided_slice %177 {offsets = [0, 0], sizes = [2, 128], strides = [1, 1]} : vector<2x256xf32> to vector<2x128xf32>
    %181 = vector.extract_strided_slice %179 {offsets = [0, 0], sizes = [2, 128], strides = [1, 1]} : vector<2x256xf32> to vector<2x128xf32>
    %182 = arith.addf %180, %181 : vector<2x128xf32>
    %cst_63 = arith.constant 0.000000e+00 : f32
    %183 = vector.broadcast %cst_63 : f32 to vector<2x128xf32>
    %184 = arith.subf %183, %182 : vector<2x128xf32>
    %185 = math.exp %184 : vector<2x128xf32>
    %cst_64 = arith.constant 1.000000e+00 : f32
    %186 = vector.broadcast %cst_64 : f32 to vector<2x128xf32>
    %187 = arith.addf %186, %185 : vector<2x128xf32>
    %cst_65 = arith.constant 1.000000e+00 : f32
    %188 = vector.broadcast %cst_65 : f32 to vector<2x128xf32>
    %189 = arith.divf %188, %187 : vector<2x128xf32>
    %190 = vector.extract_strided_slice %189 {offsets = [0, 0], sizes = [2, 64], strides = [1, 1]} : vector<2x128xf32> to vector<2x64xf32>
    %191 = vector.extract_strided_slice %189 {offsets = [0, 64], sizes = [2, 64], strides = [1, 1]} : vector<2x128xf32> to vector<2x64xf32>
    %192 = vector.extract_strided_slice %177 {offsets = [0, 128], sizes = [2, 64], strides = [1, 1]} : vector<2x256xf32> to vector<2x64xf32>
    %193 = vector.extract_strided_slice %179 {offsets = [0, 128], sizes = [2, 64], strides = [1, 1]} : vector<2x256xf32> to vector<2x64xf32>
    %194 = arith.addf %193, %13 : vector<2x64xf32>
    %195 = arith.mulf %190, %194 : vector<2x64xf32>
    %196 = arith.addf %192, %195 : vector<2x64xf32>
    %197 = math.tanh %196 : vector<2x64xf32>
    %cst_66 = arith.constant 1.000000e+00 : f32
    %198 = vector.broadcast %cst_66 : f32 to vector<2x64xf32>
    %199 = arith.subf %198, %191 : vector<2x64xf32>
    %200 = arith.mulf %199, %197 : vector<2x64xf32>
    %201 = arith.mulf %191, %170 : vector<2x64xf32>
    %202 = arith.addf %200, %201 : vector<2x64xf32>
    %203 = arith.index_cast %c5_i32 : i32 to index
    %c0_67 = arith.constant 0 : index
    %c0_68 = arith.constant 0 : index
    %204 = vector.load %arg7[%203, %c0_67, %c0_68] : memref<8x2x64xf32, #tpu.memory_space<vmem>>, vector<1x2x64xf32>
    %205 = vector.shape_cast %204 : vector<1x2x64xf32> to vector<2x64xf32>
    %206 = vector.shape_cast %202 : vector<2x64xf32> to vector<1x2x64xf32>
    tpu.vector_store %arg7[%203, %c0_67, %c0_68], %206 {strides = array<i32>} : memref<8x2x64xf32, #tpu.memory_space<vmem>>, vector<1x2x64xf32>,
    %c6_i32 = arith.constant 6 : i32
    %c2_i32_69 = arith.constant 2 : i32
    %207 = arith.muli %c6_i32, %c2_i32_69 : i32
    %208 = arith.index_cast %207 : i32 to index
    %c0_70 = arith.constant 0 : index
    %209 = vector.load %arg9[%208, %c0_70] : memref<16x256xf32, #tpu.memory_space<vmem>>, vector<2x256xf32>
    %210 = arith.truncf %202 : vector<2x64xf32> to vector<2x64xbf16>
    %cst_71 = arith.constant dense<0.000000e+00> : vector<2x256xf32>
    %211 = tpu.matmul %210, %10, %cst_71 {dimension_numbers = #tpu.dot_dimension_numbers<[1], [0], [0], [1], [0, 0, 1, 1], [], []>} : vector<2x64xbf16>, vector<64x256xbf16>, vector<2x256xf32> -> vector<2x256xf32>
    %212 = vector.extract_strided_slice %209 {offsets = [0, 0], sizes = [2, 128], strides = [1, 1]} : vector<2x256xf32> to vector<2x128xf32>
    %213 = vector.extract_strided_slice %211 {offsets = [0, 0], sizes = [2, 128], strides = [1, 1]} : vector<2x256xf32> to vector<2x128xf32>
    %214 = arith.addf %212, %213 : vector<2x128xf32>
    %cst_72 = arith.constant 0.000000e+00 : f32
    %215 = vector.broadcast %cst_72 : f32 to vector<2x128xf32>
    %216 = arith.subf %215, %214 : vector<2x128xf32>
    %217 = math.exp %216 : vector<2x128xf32>
    %cst_73 = arith.constant 1.000000e+00 : f32
    %218 = vector.broadcast %cst_73 : f32 to vector<2x128xf32>
    %219 = arith.addf %218, %217 : vector<2x128xf32>
    %cst_74 = arith.constant 1.000000e+00 : f32
    %220 = vector.broadcast %cst_74 : f32 to vector<2x128xf32>
    %221 = arith.divf %220, %219 : vector<2x128xf32>
    %222 = vector.extract_strided_slice %221 {offsets = [0, 0], sizes = [2, 64], strides = [1, 1]} : vector<2x128xf32> to vector<2x64xf32>
    %223 = vector.extract_strided_slice %221 {offsets = [0, 64], sizes = [2, 64], strides = [1, 1]} : vector<2x128xf32> to vector<2x64xf32>
    %224 = vector.extract_strided_slice %209 {offsets = [0, 128], sizes = [2, 64], strides = [1, 1]} : vector<2x256xf32> to vector<2x64xf32>
    %225 = vector.extract_strided_slice %211 {offsets = [0, 128], sizes = [2, 64], strides = [1, 1]} : vector<2x256xf32> to vector<2x64xf32>
    %226 = arith.addf %225, %13 : vector<2x64xf32>
    %227 = arith.mulf %222, %226 : vector<2x64xf32>
    %228 = arith.addf %224, %227 : vector<2x64xf32>
    %229 = math.tanh %228 : vector<2x64xf32>
    %cst_75 = arith.constant 1.000000e+00 : f32
    %230 = vector.broadcast %cst_75 : f32 to vector<2x64xf32>
    %231 = arith.subf %230, %223 : vector<2x64xf32>
    %232 = arith.mulf %231, %229 : vector<2x64xf32>
    %233 = arith.mulf %223, %202 : vector<2x64xf32>
    %234 = arith.addf %232, %233 : vector<2x64xf32>
    %235 = arith.index_cast %c6_i32 : i32 to index
    %c0_76 = arith.constant 0 : index
    %c0_77 = arith.constant 0 : index
    %236 = vector.load %arg7[%235, %c0_76, %c0_77] : memref<8x2x64xf32, #tpu.memory_space<vmem>>, vector<1x2x64xf32>
    %237 = vector.shape_cast %236 : vector<1x2x64xf32> to vector<2x64xf32>
    %238 = vector.shape_cast %234 : vector<2x64xf32> to vector<1x2x64xf32>
    tpu.vector_store %arg7[%235, %c0_76, %c0_77], %238 {strides = array<i32>} : memref<8x2x64xf32, #tpu.memory_space<vmem>>, vector<1x2x64xf32>,
    %c7_i32 = arith.constant 7 : i32
    %c2_i32_78 = arith.constant 2 : i32
    %239 = arith.muli %c7_i32, %c2_i32_78 : i32
    %240 = arith.index_cast %239 : i32 to index
    %c0_79 = arith.constant 0 : index
    %241 = vector.load %arg9[%240, %c0_79] : memref<16x256xf32, #tpu.memory_space<vmem>>, vector<2x256xf32>
    %242 = arith.truncf %234 : vector<2x64xf32> to vector<2x64xbf16>
    %cst_80 = arith.constant dense<0.000000e+00> : vector<2x256xf32>
    %243 = tpu.matmul %242, %10, %cst_80 {dimension_numbers = #tpu.dot_dimension_numbers<[1], [0], [0], [1], [0, 0, 1, 1], [], []>} : vector<2x64xbf16>, vector<64x256xbf16>, vector<2x256xf32> -> vector<2x256xf32>
    %244 = vector.extract_strided_slice %241 {offsets = [0, 0], sizes = [2, 128], strides = [1, 1]} : vector<2x256xf32> to vector<2x128xf32>
    %245 = vector.extract_strided_slice %243 {offsets = [0, 0], sizes = [2, 128], strides = [1, 1]} : vector<2x256xf32> to vector<2x128xf32>
    %246 = arith.addf %244, %245 : vector<2x128xf32>
    %cst_81 = arith.constant 0.000000e+00 : f32
    %247 = vector.broadcast %cst_81 : f32 to vector<2x128xf32>
    %248 = arith.subf %247, %246 : vector<2x128xf32>
    %249 = math.exp %248 : vector<2x128xf32>
    %cst_82 = arith.constant 1.000000e+00 : f32
    %250 = vector.broadcast %cst_82 : f32 to vector<2x128xf32>
    %251 = arith.addf %250, %249 : vector<2x128xf32>
    %cst_83 = arith.constant 1.000000e+00 : f32
    %252 = vector.broadcast %cst_83 : f32 to vector<2x128xf32>
    %253 = arith.divf %252, %251 : vector<2x128xf32>
    %254 = vector.extract_strided_slice %253 {offsets = [0, 0], sizes = [2, 64], strides = [1, 1]} : vector<2x128xf32> to vector<2x64xf32>
    %255 = vector.extract_strided_slice %253 {offsets = [0, 64], sizes = [2, 64], strides = [1, 1]} : vector<2x128xf32> to vector<2x64xf32>
    %256 = vector.extract_strided_slice %241 {offsets = [0, 128], sizes = [2, 64], strides = [1, 1]} : vector<2x256xf32> to vector<2x64xf32>
    %257 = vector.extract_strided_slice %243 {offsets = [0, 128], sizes = [2, 64], strides = [1, 1]} : vector<2x256xf32> to vector<2x64xf32>
    %258 = arith.addf %257, %13 : vector<2x64xf32>
    %259 = arith.mulf %254, %258 : vector<2x64xf32>
    %260 = arith.addf %256, %259 : vector<2x64xf32>
    %261 = math.tanh %260 : vector<2x64xf32>
    %cst_84 = arith.constant 1.000000e+00 : f32
    %262 = vector.broadcast %cst_84 : f32 to vector<2x64xf32>
    %263 = arith.subf %262, %255 : vector<2x64xf32>
    %264 = arith.mulf %263, %261 : vector<2x64xf32>
    %265 = arith.mulf %255, %234 : vector<2x64xf32>
    %266 = arith.addf %264, %265 : vector<2x64xf32>
    %267 = arith.index_cast %c7_i32 : i32 to index
    %c0_85 = arith.constant 0 : index
    %c0_86 = arith.constant 0 : index
    %268 = vector.load %arg7[%267, %c0_85, %c0_86] : memref<8x2x64xf32, #tpu.memory_space<vmem>>, vector<1x2x64xf32>
    %269 = vector.shape_cast %268 : vector<1x2x64xf32> to vector<2x64xf32>
    %270 = vector.shape_cast %266 : vector<2x64xf32> to vector<1x2x64xf32>
    tpu.vector_store %arg7[%267, %c0_85, %c0_86], %270 {strides = array<i32>} : memref<8x2x64xf32, #tpu.memory_space<vmem>>, vector<1x2x64xf32>,
    %c8_i32 = arith.constant 8 : i32
    %c0_87 = arith.constant 0 : index
    %c0_88 = arith.constant 0 : index
    %271 = vector.load %arg8[%c0_87, %c0_88] : memref<2x64xf32, #tpu.memory_space<vmem>>, vector<2x64xf32>
    tpu.vector_store %arg8[%c0_87, %c0_88], %266 {strides = array<i32>} : memref<2x64xf32, #tpu.memory_space<vmem>>, vector<2x64xf32>,
    return
  }
  func.func @transform_0(%arg0: i32) -> (i32, i32) {
    %c0_i32 = arith.constant 0 : i32
    %c0_i32_0 = arith.constant 0 : i32
    return %arg0, %c0_i32 : i32, i32
  }
  func.func @transform_1(%arg0: i32) -> (i32, i32) {
    %c0_i32 = arith.constant 0 : i32
    %c0_i32_0 = arith.constant 0 : i32
    %c0_i32_1 = arith.constant 0 : i32
    return %c0_i32, %c0_i32_0 : i32, i32
  }
  func.func @transform_2(%arg0: i32) -> (i32, i32) {
    %c0_i32 = arith.constant 0 : i32
    %c0_i32_0 = arith.constant 0 : i32
    %c0_i32_1 = arith.constant 0 : i32
    return %c0_i32, %c0_i32_0 : i32, i32
  }
  func.func @transform_3(%arg0: i32) -> (i32, i32) {
    %c0_i32 = arith.constant 0 : i32
    %c0_i32_0 = arith.constant 0 : i32
    %c0_i32_1 = arith.constant 0 : i32
    return %c0_i32, %c0_i32_0 : i32, i32
  }
  func.func @transform_4(%arg0: i32) -> (i32, i32) {
    %c0_i32 = arith.constant 0 : i32
    %c0_i32_0 = arith.constant 0 : i32
    %c0_i32_1 = arith.constant 0 : i32
    return %c0_i32, %c0_i32_0 : i32, i32
  }
  func.func @transform_5(%arg0: i32) -> (i32, i32) {
    %c0_i32 = arith.constant 0 : i32
    %c0_i32_0 = arith.constant 0 : i32
    %c0_i32_1 = arith.constant 0 : i32
    return %c0_i32, %c0_i32_0 : i32, i32
  }
  func.func @transform_6(%arg0: i32) -> (i32, i32, i32) {
    %c0_i32 = arith.constant 0 : i32
    %c0_i32_0 = arith.constant 0 : i32
    %c0_i32_1 = arith.constant 0 : i32
    return %arg0, %c0_i32, %c0_i32_0 : i32, i32, i32
  }
}

</mosaic_0001>

<bundles_post_ra>
// kernel: tpu_custom_call.1
= control target key start
LH: loop header
LB: loop body
LE: loop exit
PB: predicated region body
PF: predicated region fallthrough
CT: control target
= control target key end

     0   :  { %11 = vsyncpa [#allocation5], 0  ;;  %s1451_s0 = inlined_call_operand.hbm [shape: bf16[16,64], index: 0, kind: input, shape index: {}]   ;;  %s1452_s1 = inlined_call_operand.hbm [shape: f32[2,64], index: 1, kind: input, shape index: {}]   ;;  %s1453_s2 = inlined_call_operand.hbm [shape: bf16[64,256], index: 2, kind: input, shape index: {}]   ;;  %s1454_s3 = inlined_call_operand.hbm [shape: bf16[64,256], index: 3, kind: input, shape index: {}]   ;;  %s1455_s4 = inlined_call_operand.vmem [shape: f32[1,256], index: 4, kind: input, shape index: {}]   ;;  %s1456_s5 = inlined_call_operand.vmem [shape: f32[1,64], index: 5, kind: input, shape index: {}]   ;;  %s1457_s6 = inlined_call_operand.hbm [shape: f32[8,2,64], index: 6, kind: output, shape index: {}]  }
   0x1   :  { %12 = vsyncpa [#allocation8], 0 }
   0x2   :  { %13 = vsyncpa [#allocation11], 0  ;;  %s33_s23 = sshll.u32 %s1452_s1, 4  ;;  %s34_s23 = int_to_ptr.hbm [resolvable:$true] %s33_s23 }
   0x3   :  { %14 = vsyncpa [#allocation6], 0  ;;  %s1199_s24 = smov [#allocation7]   ;;  %s19_s28 = sshll.u32 %s1451_s0, 4  ;;  %s20_s28 = int_to_ptr.hbm [resolvable:$true] %s19_s28 }
   0x4   :  { %s35_s25 = sshll.u32 %s1199_s24, 4  ;;  %s1200_s29 = smov [#allocation4]   ;;  %s36_s25 = int_to_ptr.vmem [resolvable:$true] %s35_s25 }
   0x5   :  { %38 = dma.hbm_to_vmem [thread:$0]  %s34_s23, 32, %s36_s25, [#allocation8]  }
   0x6   :  { %s21_s30 = sshll.u32 %s1200_s29, 4  ;;  %s1201_s7 = smov 64   ;;  %s22_s30 = int_to_ptr.vmem [resolvable:$true] %s21_s30 }
   0x7   :  { %s1202_s8 = smov 4   ;;  %s43_s10 = sshll.u32 %s1453_s2, 4  ;;  %s44_s10 = int_to_ptr.hbm [resolvable:$true] %s43_s10 }
   0x8   :  { %27 = dma.hbm_to_vmem [thread:$0]  %s20_s28, 128, %s22_s30, [#allocation5], %s1201_s7, %s1201_s7, %s1202_s8  }
   0x9   :  { %s1203_s11 = smov [#allocation9]   ;;  %s56_s14 = sshll.u32 %s1454_s3, 4  ;;  %s57_s14 = int_to_ptr.hbm [resolvable:$true] %s56_s14 }
   0xa   :  { %s45_s12 = sshll.u32 %s1203_s11, 4  ;;  %s1204_s15 = smov 128   ;;  %s46_s12 = int_to_ptr.vmem [resolvable:$true] %s45_s12 }
   0xb   :  { %s1205_s16 = smov 8   ;;  %s1206_s17 = smov [#allocation10]  }
   0xc   :  { %51 = dma.hbm_to_vmem [thread:$0]  %s44_s10, 1024, %s46_s12, [#allocation8], %s1204_s15, %s1204_s15, %s1205_s16  }
   0xd   :  { %s58_s18 = sshll.u32 %s1206_s17, 4  ;;  %s59_s18 = int_to_ptr.vmem [resolvable:$true] %s58_s18 }
   0xe   :  { %64 = dma.hbm_to_vmem [thread:$0]  %s57_s14, 1024, %s59_s18, [#allocation11], %s1204_s15, %s1204_s15, %s1205_s16  }
   0xf   :  { %1191 = dma.done.wait [#allocation5], 128  }
  0x10   :  { %1192 = vsyncadd [#allocation5], 4294967168 }
  0x11   :  { %1193 = dma.done.wait [#allocation8], 1056  }
  0x12   :  { %1194 = vsyncadd [#allocation8], 4294966240 }
  0x13   :  { %1195 = dma.done.wait [#allocation11], 1024  }
  0x14   :  { %1196 = vsyncadd [#allocation11], 4294966272  ;;  %v938_v0 = vld [vmem:[#allocation9 + $0x30] sm:$0xf]  ;;  %v1002_v1 = vld [vmem:[#allocation9 + $0x34] sm:$0xf0] }
  0x15   :  { %v972_v2 = vld [vmem:[#allocation10 + $0x30] sm:$0xf]  ;;  %v939_v3 = vor.u32 %v1002_v1, %v938_v0  ;;  %v1010_v4 = vld [vmem:[#allocation10 + $0x34] sm:$0xf0]  ;;  %v930_v5 = vld [vmem:[#allocation9 + $0x20] sm:$0xf] }
  0x16   :  { %v1000_v6 = vld [vmem:[#allocation9 + $0x24] sm:$0xf0]  ;;  %v1259_v7 = vor.u32 %v1010_v4, %v972_v2  ;;  %v964_v8 = vld [vmem:[#allocation10 + $0x20] sm:$0xf]  ;;  %vm91_vm0 = vcmask 517120   ;;  %v994_v43 = vld [vmem:[#allocation4] sm:$0xff] }
  0x17   :  { %v1008_v9 = vld [vmem:[#allocation10 + $0x24] sm:$0xf0]  ;;  %162 = vmatpush.bf16.msra.mxu0 %v939_v3  ;;  %v931_v10 = vor.u32 %v1000_v6, %v930_v5  ;;  %v922_v12 = vld [vmem:[#allocation9 + $0x10] sm:$0xf]  ;;  %v998_v13 = vld [vmem:[#allocation9 + $0x14] sm:$0xf0] }
  0x18   :  { %253 = vmatpush.bf16.msra.mxu2 %v1259_v7  ;;  %v1262_v11 = vor.u32 %v1008_v9, %v964_v8  ;;  %v956_v14 = vld [vmem:[#allocation10 + $0x10] sm:$0xf]  ;;  %v1006_v15 = vld [vmem:[#allocation10 + $0x14] sm:$0xf0]  ;;  %v90_v16 = vld [vmem:[#allocation7] sm:$0x3]  ;;  %v923_v21 = vor.u32 %v998_v13, %v922_v12 }
  0x19   :  { %v914_v17 = vld [vmem:[#allocation9] sm:$0xf]  ;;  %v996_v18 = vld [vmem:[#allocation9 + $0x4] sm:$0xf0]  ;;  %92 = vst.msk [vmem:[#allocation2] sm:$0x3] %vm91_vm0, %v90_v16  ;;  %v1266_v26 = vor.u32 %v1006_v15, %v956_v14 }
  0x1a   :  { %v1001_v19 = vld [vmem:[#allocation9 + $0x34] sm:$0xf]  ;;  %v940_v20 = vld [vmem:[#allocation9 + $0x38] sm:$0xf0]  ;;  %v999_v25 = vld [vmem:[#allocation9 + $0x24] sm:$0xf]  ;;  %v915_v37 = vor.u32 %v996_v18, %v914_v17 }
  0x1b   :  { %163 = vmatpush.bf16.msra.mxu0 %v931_v10  ;;  %v943_v22 = vor.u32 %v1001_v19, %v940_v20  ;;  %v1009_v23 = vld [vmem:[#allocation10 + $0x34] sm:$0xf]  ;;  %v974_v24 = vld [vmem:[#allocation10 + $0x38] sm:$0xf0]  ;;  %v932_v28 = vld [vmem:[#allocation9 + $0x28] sm:$0xf0] }
  0x1c   :  { %254 = vmatpush.bf16.msra.mxu2 %v1262_v11  ;;  %v1268_v27 = vor.u32 %v1009_v23, %v974_v24  ;;  %v1007_v29 = vld [vmem:[#allocation10 + $0x24] sm:$0xf]  ;;  %v966_v30 = vld [vmem:[#allocation10 + $0x28] sm:$0xf0]  ;;  %v948_v31 = vld [vmem:[#allocation10] sm:$0xf]  ;;  %v935_v33 = vor.u32 %v999_v25, %v932_v28 }
  0x1d   :  { %v1004_v32 = vld [vmem:[#allocation10 + $0x4] sm:$0xf0]  ;;  %176 = vmatpush.bf16.msra.mxu1 %v943_v22  ;;  %v1271_v34 = vor.u32 %v1007_v29, %v966_v30  ;;  %v997_v35 = vld [vmem:[#allocation9 + $0x14] sm:$0xf]  ;;  %v924_v36 = vld [vmem:[#allocation9 + $0x18] sm:$0xf0] }
  0x1e   :  { %266 = vmatpush.bf16.msra.mxu3 %v1268_v27  ;;  %v1005_v38 = vld [vmem:[#allocation10 + $0x14] sm:$0xf]  ;;  %v958_v39 = vld [vmem:[#allocation10 + $0x18] sm:$0xf0]  ;;  %v1274_v40 = vor.u32 %v1004_v32, %v948_v31  ;;  %v927_v42 = vor.u32 %v997_v35, %v924_v36  ;;  %v995_v45 = vld [vmem:[#allocation9 + $0x4] sm:$0xf] }
  0x1f   :  { %164 = vmatpush.bf16.msra.mxu0 %v923_v21  ;;  %v1279_v44 = vor.u32 %v1005_v38, %v958_v39  ;;  %v916_v46 = vld [vmem:[#allocation9 + $0x8] sm:$0xf0]  ;;  %vm154_vm1 = vcmask 523264   ;;  %v1003_v48 = vld [vmem:[#allocation10 + $0x4] sm:$0xf]  ;;  %s893_s23 = sshll.u32 %s1457_s6, 4  ;;  %s894_s23 = int_to_ptr.hbm [resolvable:$true] %s893_s23 }
  0x20   :  { %255 = vmatpush.bf16.msra.mxu2 %v1266_v26  ;;  %v1276_v41 = vld [vmem:[#allocation2] sm:$0x3]  ;;  %v950_v49 = vld [vmem:[#allocation10 + $0x8] sm:$0xf0]  ;;  %v919_v50 = vor.u32 %v995_v45, %v916_v46  ;;  %s1208_s24 = smov 32   ;;  %s1209_s25 = smov 2  }
  0x21   :  { %177 = vmatpush.bf16.msra.mxu1 %v935_v33  ;;  %v205_v47 = vpack.c.bf16 %v1276_v41, %v1276_v41  ;;  %v1288_v51 = vor.u32 %v1003_v48, %v950_v49  ;;  %v103_v52 = vld [vmem:[%s1455_s4] sm:$0x3] }
  0x22   :  { %267 = vmatpush.bf16.msra.mxu3 %v1271_v34  ;;  %v105_v53 = vperm.slane %v103_v52, 0  ;;  %v106_v56 = vperm.slane %v103_v52, 1  ;;  %v1330_v13 = vld [vmem:[%s1456_s5] ss:$0 sm:$0xff]  ;;  %s1207_s5 = smov [#allocation12]  }
  0x23   :  { %165 = vmatpush.bf16.msra.mxu0 %v915_v37  ;;  %s891_s20 = sshll.u32 %s1207_s5, 4  ;;  %s892_s20 = int_to_ptr.vmem [resolvable:$true] %s891_s20 }
  0x24   :  { %256 = vmatpush.bf16.msra.mxu2 %v1274_v40 }
  0x25   :  { %178 = vmatpush.bf16.msra.mxu1 %v927_v42 }
  0x26   :  { %944 = vmatmul.msk.bf16.vlgmr.msra.gmra.mxu0 %vm154_vm1, %v994_v43  ;;  %268 = vmatpush.bf16.msra.mxu3 %v1279_v44 }
  0x27   :  { %330 = vmatpush.bf16.msrb.mxu0 %v1259_v7  ;;  %978 = vmatmul.msk.bf16.vlgmr.msra.gmra.mxu2 %vm154_vm1, %v205_v47 }
  0x28   :  { %413 = vmatpush.bf16.msrb.mxu2 %v1259_v7 }
  0x29   :  { %179 = vmatpush.bf16.msra.mxu1 %v919_v50 }
  0x2a   :  { %269 = vmatpush.bf16.msra.mxu3 %v1288_v51 }
  0x2b   :  { %331 = vmatpush.bf16.msrb.mxu0 %v1262_v11 }
  0x2c   :  { %414 = vmatpush.bf16.msrb.mxu2 %v1262_v11  ;;  %945 = vmatmul.msk.bf16.vlgmr.msra.gmra.mxu1 %vm154_vm1, %v994_v43 }
  0x2d   :  { %343 = vmatpush.bf16.msrb.mxu1 %v1268_v27  ;;  %979 = vmatmul.msk.bf16.vlgmr.msra.gmra.mxu3 %vm154_vm1, %v205_v47 }
  0x2e   :  { %426 = vmatpush.bf16.msrb.mxu3 %v1268_v27 }
  0x2f   :  { %332 = vmatpush.bf16.msrb.mxu0 %v1266_v26 }
  0x30   :  { %415 = vmatpush.bf16.msrb.mxu2 %v1266_v26 }
  0x31   :  { %344 = vmatpush.bf16.msrb.mxu1 %v1271_v34 }
  0x32   :  { %427 = vmatpush.bf16.msrb.mxu3 %v1271_v34 }
  0x33   :  { %333 = vmatpush.bf16.msrb.mxu0 %v1274_v40 }
  0x34   :  { %416 = vmatpush.bf16.msrb.mxu2 %v1274_v40 }
  0x35   :  { %345 = vmatpush.bf16.msrb.mxu1 %v1279_v44 }
  0x36   :  { %428 = vmatpush.bf16.msrb.mxu3 %v1279_v44 }
  0x37   :  { %496 = vmatpush.bf16.msra.mxu0 %v1259_v7 }
  0x38   :  { %579 = vmatpush.bf16.msra.mxu2 %v1259_v7 }
  0x39   :  { %346 = vmatpush.bf16.msrb.mxu1 %v1288_v51 }
  0x3a   :  { %429 = vmatpush.bf16.msrb.mxu3 %v1288_v51 }
  0x3b   :  { %497 = vmatpush.bf16.msra.mxu0 %v1262_v11 }
  0x3c   :  { %580 = vmatpush.bf16.msra.mxu2 %v1262_v11 }
  0x3d   :  { %509 = vmatpush.bf16.msra.mxu1 %v1268_v27 }
  0x3e   :  { %592 = vmatpush.bf16.msra.mxu3 %v1268_v27 }
  0x3f   :  { %498 = vmatpush.bf16.msra.mxu0 %v1266_v26 }
  0x40   :  { %581 = vmatpush.bf16.msra.mxu2 %v1266_v26 }
  0x41   :  { %510 = vmatpush.bf16.msra.mxu1 %v1271_v34 }
  0x42   :  { %593 = vmatpush.bf16.msra.mxu3 %v1271_v34 }
  0x43   :  { %499 = vmatpush.bf16.msra.mxu0 %v1274_v40 }
  0x44   :  { %582 = vmatpush.bf16.msra.mxu2 %v1274_v40 }
  0x45   :  { %511 = vmatpush.bf16.msra.mxu1 %v1279_v44 }
  0x46   :  { %594 = vmatpush.bf16.msra.mxu3 %v1279_v44 }
  0x49   :  { %512 = vmatpush.bf16.msra.mxu1 %v1288_v51 }
  0x4a   :  { %595 = vmatpush.bf16.msra.mxu3 %v1288_v51 }
  0xa3   :  { %v167_v54 = vpop.f32.mrf.mxu0 }
  0xa4   :  { %v168_v55 = vadd.f32 %v167_v54, %v105_v53 }
  0xa6   :  { %186 = vst [vmem:[#allocation3 + $0x10] sm:$0xff] %v168_v55 }
  0xa9   :  { %v181_v57 = vpop.f32.mrf.mxu1 }
  0xaa   :  { %v258_v58 = vpop.f32.mrf.mxu2  ;;  %v182_v59 = vadd.f32 %v181_v57, %v106_v56 }
  0xab   :  { %v169_v60 = vpop.f32.mrf.mxu0 }
  0xac   :  { %v170_v61 = vadd.f32 %v169_v60, %v105_v53  ;;  %187 = vst [vmem:[#allocation3] sm:$0xff] %v182_v59 }
  0xad   :  { %v203_v62 = vld [vmem:[#allocation3 + $0x10] sm:$0x3]  ;;  %v317_v42 = vld [vmem:[#allocation3 + $0x10] sm:$0xc] }
  0xae   :  { %v275_v63 = vadd.f32 %v258_v58, %v203_v62  ;;  %188 = vst [vmem:[#allocation3 + $0x18] sm:$0xff] %v170_v61 }
  0xb0   :  { %v276_v0 = vsub.f32 0.0, %v275_v63  ;;  %v271_v1 = vpop.f32.mrf.mxu3 }
  0xb1   :  { %v183_v2 = vpop.f32.mrf.mxu1  ;;  %v295_v19 = vadd.f32 %v1330_v13, %v271_v1 }
  0xb2   :  { %v277_v3 = vmul.f32 1.442695, %v276_v0  ;;  %v260_v4 = vpop.f32.mrf.mxu2  ;;  %v184_v5 = vadd.f32 %v183_v2, %v106_v56 }
  0xb3   :  { %v204_v23 = vld [vmem:[#allocation3] sm:$0x3]  ;;  %v318_v1 = vld [vmem:[#allocation3] sm:$0xc] }
  0xb4   :  { %1023 = vpow2.f32 %v277_v3  ;;  %189 = vst [vmem:[#allocation3 + $0x8] sm:$0xff] %v184_v5 }
  0xb8   :  { %v273_v6 = vpop.f32.mrf.mxu3 }
  0xba   :  { %v1024_v8 = vpop.eup %1023 }
  0xbb   :  { %v279_v9 = vadd.f32 1.0, %v1024_v8 }
  0xbd   :  { %1025 = vrcp.f32 %v279_v9  ;;  %v291_v15 = vand.u32 2147483648, %v279_v9  ;;  %v289_v17 = vand.u32 2147483647, %v279_v9  ;;  %vm285_vm3 = vweird.f32 %v279_v9 }
  0xbf   :  { %v292_v20 = vor.u32 1.1754944e-38, %v291_v15  ;;  %vm290_vm5 = vcmp.eq.f32.partialorder %v289_v17, 8.507059e+37 }
  0xc3   :  { %v1026_v10 = vpop.eup %1025 }
  0xc4   :  { %v281_v12 = vmul.f32 %v1026_v10, %v279_v9  ;;  %vm286_vm2 = vweird.f32 %v1026_v10 }
  0xc5   :  { %vm287_vm4 = vmor %vm285_vm3, %vm286_vm2 }
  0xc6   :  { %v282_v14 = vsub.f32 1.0, %v281_v12 }
  0xc8   :  { %v283_v16 = vmul.f32 %v1026_v10, %v282_v14 }
  0xca   :  { %v284_v18 = vadd.f32 %v1026_v10, %v283_v16 }
  0xcc   :  { %v288_v21 = vsel %vm287_vm4, %v1026_v10, %v284_v18 }
  0xcd   :  { %v293_v22 = vsel %vm290_vm5, %v292_v20, %v288_v21 }
  0xce   :  { %v296_v24 = vmul.f32 %v295_v19, %v293_v22  ;;  %v299_v30 = vsub.f32 1.0, %v293_v22  ;;  %v399_v19 = vld [vmem:[#allocation3 + $0x10] sm:$0x30] }
  0xd0   :  { %v297_v25 = vadd.f32 %v296_v24, %v204_v23 }
  0xd2   :  { %1027 = vtanh.f32 %v297_v25 }
  0xd8   :  { %v1028_v28 = vpop.eup %1027 }
  0xd9   :  { %301 = vrot.lane.b32.xlu0 %v1028_v28, %s1201_s7 }
  0xe1   :  { %306 = vrot.lane.b32.xlu0 %v1276_v41, %s1201_s7 }
 0x14b   :  { %v302_v29 = vpop.permute.xlu0 %301 }
 0x14c   :  { %v304_v32 = vmul.f32 %v302_v29, %v299_v30 }
 0x153   :  { %v307_v31 = vpop.permute.xlu0 %306 }
 0x154   :  { %v309_v33 = vmul.f32 %v307_v31, %v293_v22 }
 0x156   :  { %v1336_v35 = vadd.f32 %v309_v33, %v304_v32 }
 0x158   :  { %v319_v36 = vpack.c.bf16 %v1336_v35, %v1336_v35  ;;  %v388_v5 = vrot.slane %v1336_v35, 6 }
 0x15a   :  { %321 = vrot.lane.b32.xlu1 %v319_v36, %s1201_s7 }
 0x1cc   :  { %v322_v37 = vpop.permute.xlu1 %321 }
 0x1cd   :  { %980 = vmatmul.msk.bf16.vlgmr.msrb.gmra.mxu0 %vm154_vm1, %v322_v37  ;;  %981 = vmatmul.msk.bf16.vlgmr.msrb.gmra.mxu1 %vm154_vm1, %v322_v37 }
 0x1ce   :  { %654 = vmatpush.bf16.msrb.mxu0 %v1259_v7  ;;  %667 = vmatpush.bf16.msrb.mxu1 %v1268_v27 }
 0x1d2   :  { %655 = vmatpush.bf16.msrb.mxu0 %v1262_v11  ;;  %668 = vmatpush.bf16.msrb.mxu1 %v1271_v34 }
 0x1d6   :  { %656 = vmatpush.bf16.msrb.mxu0 %v1266_v26  ;;  %669 = vmatpush.bf16.msrb.mxu1 %v1279_v44 }
 0x1da   :  { %657 = vmatpush.bf16.msrb.mxu0 %v1274_v40  ;;  %670 = vmatpush.bf16.msrb.mxu1 %v1288_v51 }
 0x24a   :  { %v335_v38 = vpop.f32.mrf.mxu0  ;;  %v348_v39 = vpop.f32.mrf.mxu1 }
 0x24b   :  { %v353_v41 = vrot.slane %v335_v38, 6  ;;  %v375_v58 = vadd.f32 %v1330_v13, %v348_v39 }
 0x24d   :  { %v355_v43 = vadd.f32 %v353_v41, %v317_v42  ;;  %v377_v62 = vrot.slane %v375_v58, 6 }
 0x24f   :  { %v356_v45 = vsub.f32 0.0, %v355_v43 }
 0x251   :  { %v357_v46 = vmul.f32 1.442695, %v356_v45 }
 0x252   :  { %v337_v47 = vpop.f32.mrf.mxu0  ;;  %v350_v48 = vpop.f32.mrf.mxu1 }
 0x253   :  { %1029 = vpow2.f32 %v357_v46  ;;  %v400_v46 = vld [vmem:[#allocation3] sm:$0x30] }
 0x259   :  { %v1030_v49 = vpop.eup %1029 }
 0x25a   :  { %v359_v50 = vadd.f32 1.0, %v1030_v49 }
 0x25c   :  { %1031 = vrcp.f32 %v359_v50  ;;  %v371_v55 = vand.u32 2147483648, %v359_v50  ;;  %v369_v57 = vand.u32 2147483647, %v359_v50  ;;  %vm365_vm7 = vweird.f32 %v359_v50 }
 0x25e   :  { %v372_v60 = vor.u32 1.1754944e-38, %v371_v55  ;;  %vm370_vm9 = vcmp.eq.f32.partialorder %v369_v57, 8.507059e+37 }
 0x262   :  { %v1032_v52 = vpop.eup %1031 }
 0x263   :  { %v361_v53 = vmul.f32 %v1032_v52, %v359_v50  ;;  %vm366_vm6 = vweird.f32 %v1032_v52 }
 0x264   :  { %vm367_vm8 = vmor %vm365_vm7, %vm366_vm6 }
 0x265   :  { %v362_v54 = vsub.f32 1.0, %v361_v53 }
 0x267   :  { %v363_v56 = vmul.f32 %v1032_v52, %v362_v54 }
 0x269   :  { %v364_v59 = vadd.f32 %v1032_v52, %v363_v56 }
 0x26b   :  { %v368_v61 = vsel %vm367_vm8, %v1032_v52, %v364_v59 }
 0x26c   :  { %v373_v63 = vsel %vm370_vm9, %v372_v60, %v368_v61 }
 0x26d   :  { %v379_v0 = vmul.f32 %v377_v62, %v373_v63  ;;  %v382_v4 = vsub.f32 1.0, %v373_v63  ;;  %v390_v8 = vmul.f32 %v388_v5, %v373_v63  ;;  %v482_v62 = vld [vmem:[#allocation3 + $0x10] sm:$0xc0] }
 0x26f   :  { %v380_v2 = vadd.f32 %v379_v0, %v318_v1 }
 0x271   :  { %1033 = vtanh.f32 %v380_v2 }
 0x277   :  { %v1034_v3 = vpop.eup %1033 }
 0x278   :  { %384 = vrot.lane.b32.xlu1 %v1034_v3, %s1201_s7 }
 0x2ea   :  { %v385_v6 = vpop.permute.xlu1 %384 }
 0x2eb   :  { %v387_v9 = vmul.f32 %v385_v6, %v382_v4 }
 0x2ed   :  { %v1354_v10 = vadd.f32 %v390_v8, %v387_v9 }
 0x2ef   :  { %v401_v12 = vpack.c.bf16 %v1354_v10, %v1354_v10  ;;  %v471_v50 = vrot.slane %v1354_v10, 6 }
 0x2f1   :  { %v403_v14 = vrot.slane %v401_v12, 1 }
 0x2f3   :  { %404 = vrot.lane.b32.xlu2 %v403_v14, %s1201_s7 }
 0x34d   :  { %v405_v15 = vpop.permute.xlu2 %404 }
 0x34e   :  { %982 = vmatmul.msk.bf16.vlgmr.msrb.gmra.mxu2 %vm154_vm1, %v405_v15  ;;  %983 = vmatmul.msk.bf16.vlgmr.msrb.gmra.mxu3 %vm154_vm1, %v405_v15  ;;  %v483_v15 = vld [vmem:[#allocation3] sm:$0xc0] }
 0x34f   :  { %736 = vmatpush.bf16.msrb.mxu2 %v1259_v7  ;;  %749 = vmatpush.bf16.msrb.mxu3 %v1268_v27 }
 0x353   :  { %737 = vmatpush.bf16.msrb.mxu2 %v1262_v11  ;;  %750 = vmatpush.bf16.msrb.mxu3 %v1271_v34 }
 0x357   :  { %738 = vmatpush.bf16.msrb.mxu2 %v1266_v26  ;;  %751 = vmatpush.bf16.msrb.mxu3 %v1279_v44 }
 0x35b   :  { %739 = vmatpush.bf16.msrb.mxu2 %v1274_v40  ;;  %752 = vmatpush.bf16.msrb.mxu3 %v1288_v51 }
 0x3d1   :  { %v418_v16 = vpop.f32.mrf.mxu2  ;;  %v431_v17 = vpop.f32.mrf.mxu3 }
 0x3d2   :  { %v436_v18 = vrot.slane %v418_v16, 4  ;;  %v458_v37 = vadd.f32 %v1330_v13, %v431_v17 }
 0x3d4   :  { %v438_v20 = vadd.f32 %v436_v18, %v399_v19  ;;  %v460_v42 = vrot.slane %v458_v37, 4 }
 0x3d6   :  { %v439_v21 = vsub.f32 0.0, %v438_v20 }
 0x3d8   :  { %v440_v22 = vmul.f32 1.442695, %v439_v21 }
 0x3d9   :  { %v420_v23 = vpop.f32.mrf.mxu2  ;;  %v433_v24 = vpop.f32.mrf.mxu3 }
 0x3da   :  { %1035 = vpow2.f32 %v440_v22 }
 0x3e0   :  { %v1036_v25 = vpop.eup %1035 }
 0x3e1   :  { %v442_v28 = vadd.f32 1.0, %v1036_v25 }
 0x3e3   :  { %1037 = vrcp.f32 %v442_v28  ;;  %v454_v32 = vand.u32 2147483648, %v442_v28  ;;  %v452_v36 = vand.u32 2147483647, %v442_v28  ;;  %vm448_vm11 = vweird.f32 %v442_v28 }
 0x3e5   :  { %v455_v39 = vor.u32 1.1754944e-38, %v454_v32  ;;  %vm453_vm13 = vcmp.eq.f32.partialorder %v452_v36, 8.507059e+37 }
 0x3e9   :  { %v1038_v29 = vpop.eup %1037 }
 0x3ea   :  { %v444_v30 = vmul.f32 %v1038_v29, %v442_v28  ;;  %vm449_vm10 = vweird.f32 %v1038_v29 }
 0x3eb   :  { %vm450_vm12 = vmor %vm448_vm11, %vm449_vm10 }
 0x3ec   :  { %v445_v31 = vsub.f32 1.0, %v444_v30 }
 0x3ee   :  { %v446_v33 = vmul.f32 %v1038_v29, %v445_v31 }
 0x3f0   :  { %v447_v38 = vadd.f32 %v1038_v29, %v446_v33 }
 0x3f2   :  { %v451_v41 = vsel %vm450_vm12, %v1038_v29, %v447_v38  ;;  %v565_v29 = vld [vmem:[#allocation3 + $0x18] sm:$0x3] }
 0x3f3   :  { %v456_v43 = vsel %vm453_vm13, %v455_v39, %v451_v41 }
 0x3f4   :  { %v462_v45 = vmul.f32 %v460_v42, %v456_v43  ;;  %v465_v49 = vsub.f32 1.0, %v456_v43  ;;  %v473_v53 = vmul.f32 %v471_v50, %v456_v43 }
 0x3f6   :  { %v463_v47 = vadd.f32 %v462_v45, %v400_v46 }
 0x3f8   :  { %1039 = vtanh.f32 %v463_v47 }
 0x3fe   :  { %v1040_v48 = vpop.eup %1039 }
 0x3ff   :  { %467 = vrot.lane.b32.xlu2 %v1040_v48, %s1201_s7 }
 0x459   :  { %v468_v52 = vpop.permute.xlu2 %467 }
 0x45a   :  { %v470_v54 = vmul.f32 %v468_v52, %v465_v49 }
 0x45c   :  { %v1372_v55 = vadd.f32 %v473_v53, %v470_v54 }
 0x45e   :  { %v484_v56 = vpack.c.bf16 %v1372_v55, %v1372_v55  ;;  %v554_v19 = vrot.slane %v1372_v55, 6 }
 0x460   :  { %v486_v57 = vrot.slane %v484_v56, 2 }
 0x462   :  { %487 = vrot.lane.b32.xlu0 %v486_v57, %s1201_s7  ;;  %v566_v57 = vld [vmem:[#allocation3 + $0x8] sm:$0x3] }
 0x4d4   :  { %v488_v58 = vpop.permute.xlu0 %487 }
 0x4d5   :  { %984 = vmatmul.msk.bf16.vlgmr.msra.gmra.mxu0 %vm154_vm1, %v488_v58  ;;  %985 = vmatmul.msk.bf16.vlgmr.msra.gmra.mxu1 %vm154_vm1, %v488_v58 }
 0x4d6   :  { %818 = vmatpush.bf16.msra.mxu0 %v1259_v7  ;;  %831 = vmatpush.bf16.msra.mxu1 %v1268_v27 }
 0x4da   :  { %819 = vmatpush.bf16.msra.mxu0 %v1262_v11  ;;  %832 = vmatpush.bf16.msra.mxu1 %v1271_v34 }
 0x4de   :  { %820 = vmatpush.bf16.msra.mxu0 %v1266_v26  ;;  %833 = vmatpush.bf16.msra.mxu1 %v1279_v44 }
 0x4e2   :  { %821 = vmatpush.bf16.msra.mxu0 %v1274_v40  ;;  %834 = vmatpush.bf16.msra.mxu1 %v1288_v51 }
 0x552   :  { %v501_v59 = vpop.f32.mrf.mxu0  ;;  %v514_v60 = vpop.f32.mrf.mxu1 }
 0x553   :  { %v519_v61 = vrot.slane %v501_v59, 2  ;;  %v541_v4 = vadd.f32 %v1330_v13, %v514_v60 }
 0x555   :  { %v521_v63 = vadd.f32 %v519_v61, %v482_v62  ;;  %v543_v9 = vrot.slane %v541_v4, 2 }
 0x557   :  { %v522_v7 = vsub.f32 0.0, %v521_v63 }
 0x559   :  { %v523_v0 = vmul.f32 1.442695, %v522_v7 }
 0x55a   :  { %v503_v27 = vpop.f32.mrf.mxu0  ;;  %v516_v1 = vpop.f32.mrf.mxu1 }
 0x55b   :  { %1041 = vpow2.f32 %v523_v0 }
 0x561   :  { %v1042_v11 = vpop.eup %1041 }
 0x562   :  { %v525_v34 = vadd.f32 1.0, %v1042_v11 }
 0x564   :  { %1043 = vrcp.f32 %v525_v34  ;;  %v537_v3 = vand.u32 2147483648, %v525_v34  ;;  %v535_v51 = vand.u32 2147483647, %v525_v34  ;;  %vm531_vm15 = vweird.f32 %v525_v34 }
 0x566   :  { %v538_v6 = vor.u32 1.1754944e-38, %v537_v3  ;;  %vm536_vm3 = vcmp.eq.f32.partialorder %v535_v51, 8.507059e+37 }
 0x56a   :  { %v1044_v26 = vpop.eup %1043 }
 0x56b   :  { %v527_v2 = vmul.f32 %v1044_v26, %v525_v34  ;;  %vm532_vm14 = vweird.f32 %v1044_v26 }
 0x56c   :  { %vm533_vm2 = vmor %vm531_vm15, %vm532_vm14 }
 0x56d   :  { %v528_v44 = vsub.f32 1.0, %v527_v2  ;;  %v641_v2 = vld [vmem:[#allocation3 + $0x18] sm:$0xc] }
 0x56f   :  { %v529_v40 = vmul.f32 %v1044_v26, %v528_v44 }
 0x571   :  { %v530_v5 = vadd.f32 %v1044_v26, %v529_v40 }
 0x573   :  { %v534_v8 = vsel %vm533_vm2, %v1044_v26, %v530_v5  ;;  %vm563_vm2 = vcmask 523270  }
 0x574   :  { %v539_v12 = vsel %vm536_vm3, %v538_v6, %v534_v8  ;;  %vm397_vm3 = vcmask 519170  }
 0x575   :  { %v545_v14 = vmul.f32 %v543_v9, %v539_v12  ;;  %v548_v18 = vsub.f32 1.0, %v539_v12  ;;  %v556_v21 = vmul.f32 %v554_v19, %v539_v12 }
 0x577   :  { %v546_v16 = vadd.f32 %v545_v14, %v483_v15 }
 0x579   :  { %1045 = vtanh.f32 %v546_v16 }
 0x57f   :  { %v1046_v17 = vpop.eup %1045 }
 0x580   :  { %550 = vrot.lane.b32.xlu1 %v1046_v17, %s1201_s7 }
 0x5f2   :  { %v551_v20 = vpop.permute.xlu1 %550 }
 0x5f3   :  { %v553_v22 = vmul.f32 %v551_v20, %v548_v18 }
 0x5f5   :  { %v1390_v23 = vadd.f32 %v556_v21, %v553_v22 }
 0x5f7   :  { %v567_v24 = vpack.c.bf16 %v1390_v23, %v1390_v23  ;;  %v631_v61 = vrot.slane %v1390_v23, 6 }
 0x5f9   :  { %v569_v25 = vrot.slane %v567_v24, 3 }
 0x5fb   :  { %570 = vrot.lane.b32.xlu2 %v569_v25, %s1201_s7  ;;  %v642_v25 = vld [vmem:[#allocation3 + $0x8] sm:$0xc] }
 0x655   :  { %v571_v28 = vpop.permute.xlu2 %570 }
 0x656   :  { %986 = vmatmul.msk.bf16.vlgmr.msra.gmra.mxu2 %vm154_vm1, %v571_v28  ;;  %987 = vmatmul.msk.bf16.vlgmr.msra.gmra.mxu3 %vm154_vm1, %v571_v28 }
 0x6d9   :  { %v584_v30 = vpop.f32.mrf.mxu2  ;;  %v597_v31 = vpop.f32.mrf.mxu3 }
 0x6da   :  { %v601_v32 = vadd.f32 %v584_v30, %v565_v29  ;;  %v621_v53 = vadd.f32 %v1330_v13, %v597_v31 }
 0x6dc   :  { %v602_v33 = vsub.f32 0.0, %v601_v32 }
 0x6de   :  { %v603_v36 = vmul.f32 1.442695, %v602_v33 }
 0x6e0   :  { %1047 = vpow2.f32 %v603_v36 }
 0x6e1   :  { %v586_v37 = vpop.f32.mrf.mxu2  ;;  %v599_v38 = vpop.f32.mrf.mxu3 }
 0x6e6   :  { %v1048_v39 = vpop.eup %1047 }
 0x6e7   :  { %v605_v41 = vadd.f32 1.0, %v1048_v39 }
 0x6e9   :  { %1049 = vrcp.f32 %v605_v41  ;;  %v617_v46 = vand.u32 2147483648, %v605_v41  ;;  %v615_v48 = vand.u32 2147483647, %v605_v41  ;;  %vm611_vm5 = vweird.f32 %v605_v41 }
 0x6eb   :  { %v618_v50 = vor.u32 1.1754944e-38, %v617_v46  ;;  %vm616_vm7 = vcmp.eq.f32.partialorder %v615_v48, 8.507059e+37  ;;  %v722_v46 = vld [vmem:[#allocation3 + $0x18] sm:$0x30] }
 0x6ef   :  { %v1050_v42 = vpop.eup %1049 }
 0x6f0   :  { %v607_v43 = vmul.f32 %v1050_v42, %v605_v41  ;;  %vm612_vm4 = vweird.f32 %v1050_v42 }
 0x6f1   :  { %vm613_vm6 = vmor %vm611_vm5, %vm612_vm4  ;;  %vm480_vm4 = vcmask 521220  }
 0x6f2   :  { %v608_v45 = vsub.f32 1.0, %v607_v43 }
 0x6f4   :  { %v609_v47 = vmul.f32 %v1050_v42, %v608_v45 }
 0x6f6   :  { %v610_v49 = vadd.f32 %v1050_v42, %v609_v47 }
 0x6f8   :  { %v614_v52 = vsel %vm613_vm6, %v1050_v42, %v610_v49 }
 0x6f9   :  { %v619_v54 = vsel %vm616_vm7, %v618_v50, %v614_v52 }
 0x6fa   :  { %v622_v56 = vmul.f32 %v621_v53, %v619_v54  ;;  %v625_v60 = vsub.f32 1.0, %v619_v54  ;;  %v633_v63 = vmul.f32 %v631_v61, %v619_v54 }
 0x6fc   :  { %v623_v58 = vadd.f32 %v622_v56, %v566_v57 }
 0x6fe   :  { %1051 = vtanh.f32 %v623_v58 }
 0x704   :  { %v1052_v59 = vpop.eup %1051 }
 0x705   :  { %627 = vrot.lane.b32.xlu0 %v1052_v59, %s1201_s7 }
 0x777   :  { %v628_v62 = vpop.permute.xlu0 %627 }
 0x778   :  { %v630_v7 = vmul.f32 %v628_v62, %v625_v60 }
 0x77a   :  { %v1400_v0 = vadd.f32 %v633_v63, %v630_v7 }
 0x77c   :  { %v643_v27 = vpack.c.bf16 %v1400_v0, %v1400_v0  ;;  %v712_v31 = vrot.slane %v1400_v0, 6 }
 0x77e   :  { %645 = vrot.lane.b32.xlu1 %v643_v27, %s1201_s7 }
 0x7f0   :  { %v646_v1 = vpop.permute.xlu1 %645 }
 0x7f1   :  { %988 = vmatmul.msk.bf16.vlgmr.msrb.gmra.mxu0 %vm154_vm1, %v646_v1  ;;  %989 = vmatmul.msk.bf16.vlgmr.msrb.gmra.mxu1 %vm154_vm1, %v646_v1 }
 0x86e   :  { %v659_v11 = vpop.f32.mrf.mxu0  ;;  %v672_v34 = vpop.f32.mrf.mxu1 }
 0x86f   :  { %v677_v26 = vrot.slane %v659_v11, 6  ;;  %v699_v17 = vadd.f32 %v1330_v13, %v672_v34 }
 0x871   :  { %v679_v44 = vadd.f32 %v677_v26, %v641_v2  ;;  %v701_v21 = vrot.slane %v699_v17, 6  ;;  %v723_v26 = vld [vmem:[#allocation3 + $0x8] sm:$0x30] }
 0x873   :  { %v680_v3 = vsub.f32 0.0, %v679_v44 }
 0x875   :  { %v681_v40 = vmul.f32 1.442695, %v680_v3 }
 0x876   :  { %v661_v51 = vpop.f32.mrf.mxu0  ;;  %v674_v4 = vpop.f32.mrf.mxu1 }
 0x877   :  { %1053 = vpow2.f32 %v681_v40 }
 0x87d   :  { %v1054_v5 = vpop.eup %1053 }
 0x87e   :  { %v683_v6 = vadd.f32 1.0, %v1054_v5 }
 0x880   :  { %1055 = vrcp.f32 %v683_v6  ;;  %v695_v14 = vand.u32 2147483648, %v683_v6  ;;  %v693_v16 = vand.u32 2147483647, %v683_v6  ;;  %vm689_vm9 = vweird.f32 %v683_v6 }
 0x882   :  { %v696_v19 = vor.u32 1.1754944e-38, %v695_v14  ;;  %vm694_vm11 = vcmp.eq.f32.partialorder %v693_v16, 8.507059e+37 }
 0x886   :  { %v1056_v8 = vpop.eup %1055 }
 0x887   :  { %v685_v9 = vmul.f32 %v1056_v8, %v683_v6  ;;  %vm690_vm8 = vweird.f32 %v1056_v8 }
 0x888   :  { %vm691_vm10 = vmor %vm689_vm9, %vm690_vm8 }
 0x889   :  { %v686_v12 = vsub.f32 1.0, %v685_v9 }
 0x88b   :  { %v687_v15 = vmul.f32 %v1056_v8, %v686_v12 }
 0x88d   :  { %v688_v18 = vadd.f32 %v1056_v8, %v687_v15 }
 0x88f   :  { %v692_v20 = vsel %vm691_vm10, %v1056_v8, %v688_v18 }
 0x890   :  { %v697_v22 = vsel %vm694_vm11, %v696_v19, %v692_v20 }
 0x891   :  { %v703_v24 = vmul.f32 %v701_v21, %v697_v22  ;;  %v706_v30 = vsub.f32 1.0, %v697_v22  ;;  %v714_v33 = vmul.f32 %v712_v31, %v697_v22 }
 0x893   :  { %v704_v28 = vadd.f32 %v703_v24, %v642_v25 }
 0x895   :  { %1057 = vtanh.f32 %v704_v28 }
 0x89b   :  { %v1058_v29 = vpop.eup %1057 }
 0x89c   :  { %708 = vrot.lane.b32.xlu2 %v1058_v29, %s1201_s7 }
 0x8f6   :  { %v709_v32 = vpop.permute.xlu2 %708 }
 0x8f7   :  { %v711_v36 = vmul.f32 %v709_v32, %v706_v30 }
 0x8f9   :  { %v1410_v37 = vadd.f32 %v714_v33, %v711_v36 }
 0x8fb   :  { %v724_v38 = vpack.c.bf16 %v1410_v37, %v1410_v37  ;;  %v794_v40 = vrot.slane %v1410_v37, 6 }
 0x8fd   :  { %v726_v39 = vrot.slane %v724_v38, 1 }
 0x8ff   :  { %727 = vrot.lane.b32.xlu0 %v726_v39, %s1201_s7 }
 0x971   :  { %v728_v41 = vpop.permute.xlu0 %727 }
 0x972   :  { %990 = vmatmul.msk.bf16.vlgmr.msrb.gmra.mxu2 %vm154_vm1, %v728_v41  ;;  %991 = vmatmul.msk.bf16.vlgmr.msrb.gmra.mxu3 %vm154_vm1, %v728_v41 }
 0x9f5   :  { %v741_v42 = vpop.f32.mrf.mxu2  ;;  %v754_v43 = vpop.f32.mrf.mxu3 }
 0x9f6   :  { %v759_v45 = vrot.slane %v741_v42, 4  ;;  %v781_v62 = vadd.f32 %v1330_v13, %v754_v43 }
 0x9f8   :  { %v761_v47 = vadd.f32 %v759_v45, %v722_v46  ;;  %v783_v1 = vrot.slane %v781_v62, 4 }
 0x9fa   :  { %v762_v48 = vsub.f32 0.0, %v761_v47 }
 0x9fc   :  { %v763_v49 = vmul.f32 1.442695, %v762_v48 }
 0x9fd   :  { %v743_v50 = vpop.f32.mrf.mxu2  ;;  %v756_v52 = vpop.f32.mrf.mxu3 }
 0x9fe   :  { %1059 = vpow2.f32 %v763_v49  ;;  %v805_v49 = vld [vmem:[#allocation3 + $0x8] sm:$0xc0] }
 0xa04   :  { %v1060_v53 = vpop.eup %1059 }
 0xa05   :  { %v765_v54 = vadd.f32 1.0, %v1060_v53 }
 0xa07   :  { %1061 = vrcp.f32 %v765_v54  ;;  %v777_v59 = vand.u32 2147483648, %v765_v54  ;;  %v775_v61 = vand.u32 2147483647, %v765_v54  ;;  %vm771_vm13 = vweird.f32 %v765_v54 }
 0xa09   :  { %v778_v7 = vor.u32 1.1754944e-38, %v777_v59  ;;  %vm776_vm15 = vcmp.eq.f32.partialorder %v775_v61, 8.507059e+37 }
 0xa0d   :  { %v1062_v56 = vpop.eup %1061 }
 0xa0e   :  { %v767_v57 = vmul.f32 %v1062_v56, %v765_v54  ;;  %vm772_vm12 = vweird.f32 %v1062_v56 }
 0xa0f   :  { %vm773_vm14 = vmor %vm771_vm13, %vm772_vm12 }
 0xa10   :  { %v768_v58 = vsub.f32 1.0, %v767_v57 }
 0xa12   :  { %v769_v60 = vmul.f32 %v1062_v56, %v768_v58 }
 0xa14   :  { %v770_v63 = vadd.f32 %v1062_v56, %v769_v60 }
 0xa16   :  { %v774_v27 = vsel %vm773_vm14, %v1062_v56, %v770_v63 }
 0xa17   :  { %v779_v11 = vsel %vm776_vm15, %v778_v7, %v774_v27 }
 0xa18   :  { %v785_v34 = vmul.f32 %v783_v1, %v779_v11  ;;  %v788_v3 = vsub.f32 1.0, %v779_v11  ;;  %v796_v4 = vmul.f32 %v794_v40, %v779_v11 }
 0xa1a   :  { %v786_v2 = vadd.f32 %v785_v34, %v723_v26 }
 0xa1c   :  { %1063 = vtanh.f32 %v786_v2 }
 0xa22   :  { %v1064_v44 = vpop.eup %1063 }
 0xa23   :  { %790 = vrot.lane.b32.xlu1 %v1064_v44, %s1201_s7 }
 0xa2b   :  { %312 = vrot.lane.b32.xlu1 %v1336_v35, %s1201_s7 }
 0xa33   :  { %559 = vrot.lane.b32.xlu1 %v1390_v23, %s1201_s7 }
 0xa95   :  { %v791_v51 = vpop.permute.xlu1 %790 }
 0xa96   :  { %v793_v5 = vmul.f32 %v791_v51, %v788_v3 }
 0xa98   :  { %v797_v6 = vadd.f32 %v796_v4, %v793_v5 }
 0xa9a   :  { %799 = vrot.lane.b32.xlu1 %v797_v6, %s1201_s7  ;;  %v806_v8 = vpack.c.bf16 %v797_v6, %v797_v6  ;;  %v876_v45 = vrot.slane %v797_v6, 6 }
 0xa9c   :  { %v808_v9 = vrot.slane %v806_v8, 2 }
 0xa9d   :  { %v313_v12 = vpop.permute.xlu1 %312 }
 0xa9e   :  { %316 = vst.msk [vmem:[#allocation12] sm:$0x3] %vm91_vm0, %v313_v12  ;;  %809 = vrot.lane.b32.xlu2 %v808_v9, %s1201_s7 }
 0xaa5   :  { %v560_v35 = vpop.permute.xlu1 %559 }
 0xaa6   :  { %564 = vst.msk [vmem:[#allocation12] sm:$0xc0] %vm563_vm2, %v560_v35  ;;  %393 = vrot.lane.b32.xlu2 %v1354_v10, %s1201_s7 }
 0xaae   :  { %636 = vrot.lane.b32.xlu2 %v1400_v0, %s1201_s7  ;;  %v804_v0 = vld [vmem:[#allocation3 + $0x18] sm:$0xc0] }
 0xaf8   :  { %v810_v23 = vpop.permute.xlu2 %809 }
 0xaf9   :  { %992 = vmatmul.msk.bf16.vlgmr.msra.gmra.mxu0 %vm154_vm1, %v810_v23  ;;  %993 = vmatmul.msk.bf16.vlgmr.msra.gmra.mxu1 %vm154_vm1, %v810_v23 }
 0xb00   :  { %v394_v14 = vpop.permute.xlu2 %393 }
 0xb01   :  { %398 = vst.msk [vmem:[#allocation12] sm:$0xc] %vm397_vm3, %v394_v14 }
 0xb08   :  { %v637_v15 = vpop.permute.xlu2 %636 }
 0xb09   :  { %640 = vst.msk [vmem:[#allocation12 + $0x8] sm:$0x3] %vm91_vm0, %v637_v15 }
 0xb0c   :  { %v800_v16 = vpop.permute.xlu1 %799 }
 0xb0d   :  { %803 = vst.msk [vmem:[#allocation12 + $0x8] sm:$0x30] %vm480_vm4, %v800_v16 }
 0xb76   :  { %v823_v10 = vpop.f32.mrf.mxu0  ;;  %v836_v17 = vpop.f32.mrf.mxu1 }
 0xb77   :  { %v841_v18 = vrot.slane %v823_v10, 2  ;;  %v863_v38 = vadd.f32 %v1330_v13, %v836_v17 }
 0xb79   :  { %v843_v19 = vadd.f32 %v841_v18, %v804_v0  ;;  %v865_v43 = vrot.slane %v863_v38, 2 }
 0xb7b   :  { %v844_v20 = vsub.f32 0.0, %v843_v19 }
 0xb7d   :  { %v845_v21 = vmul.f32 1.442695, %v844_v20 }
 0xb7e   :  { %v825_v22 = vpop.f32.mrf.mxu0  ;;  %v838_v24 = vpop.f32.mrf.mxu1 }
 0xb7f   :  { %1065 = vpow2.f32 %v845_v21 }
 0xb85   :  { %v1066_v25 = vpop.eup %1065 }
 0xb86   :  { %v847_v28 = vadd.f32 1.0, %v1066_v25 }
 0xb88   :  { %1067 = vrcp.f32 %v847_v28  ;;  %v859_v32 = vand.u32 2147483648, %v847_v28  ;;  %v857_v36 = vand.u32 2147483647, %v847_v28  ;;  %vm853_vm1 = vweird.f32 %v847_v28 }
 0xb8a   :  { %v860_v41 = vor.u32 1.1754944e-38, %v859_v32  ;;  %vm858_vm6 = vcmp.eq.f32.partialorder %v857_v36, 8.507059e+37 }
 0xb8e   :  { %v1068_v29 = vpop.eup %1067 }
 0xb8f   :  { %v849_v30 = vmul.f32 %v1068_v29, %v847_v28  ;;  %vm854_vm0 = vweird.f32 %v1068_v29 }
 0xb90   :  { %vm855_vm5 = vmor %vm853_vm1, %vm854_vm0 }
 0xb91   :  { %v850_v31 = vsub.f32 1.0, %v849_v30 }
 0xb93   :  { %v851_v33 = vmul.f32 %v1068_v29, %v850_v31 }
 0xb95   :  { %v852_v39 = vadd.f32 %v1068_v29, %v851_v33 }
 0xb97   :  { %v856_v42 = vsel %vm855_vm5, %v1068_v29, %v852_v39 }
 0xb98   :  { %v861_v46 = vsel %vm858_vm6, %v860_v41, %v856_v42 }
 0xb99   :  { %v867_v47 = vmul.f32 %v865_v43, %v861_v46  ;;  %v878_v48 = vmul.f32 %v876_v45, %v861_v46  ;;  %v870_v13 = vsub.f32 1.0, %v861_v46 }
 0xb9b   :  { %v868_v50 = vadd.f32 %v867_v47, %v805_v49 }
 0xb9d   :  { %1069 = vtanh.f32 %v868_v50 }
 0xba3   :  { %v1070_v52 = vpop.eup %1069 }
 0xba4   :  { %872 = vrot.lane.b32.xlu0 %v1070_v52, %s1201_s7 }
 0xbac   :  { %476 = vrot.lane.b32.xlu0 %v1372_v55, %s1201_s7 }
 0xbb4   :  { %717 = vrot.lane.b32.xlu0 %v1410_v37, %s1201_s7 }
 0xc16   :  { %v873_v53 = vpop.permute.xlu0 %872 }
 0xc17   :  { %v875_v54 = vmul.f32 %v873_v53, %v870_v13 }
 0xc19   :  { %v879_v56 = vadd.f32 %v878_v48, %v875_v54 }
 0xc1b   :  { %881 = vrot.lane.b32.xlu2 %v879_v56, %s1201_s7 }
 0xc1e   :  { %v477_v57 = vpop.permute.xlu0 %476 }
 0xc1f   :  { %481 = vst.msk [vmem:[#allocation12] sm:$0x30] %vm480_vm4, %v477_v57 }
 0xc26   :  { %v718_v58 = vpop.permute.xlu0 %717 }
 0xc27   :  { %721 = vst.msk [vmem:[#allocation12 + $0x8] sm:$0xc] %vm397_vm3, %v718_v58 }
 0xc75   :  { %v882_v55 = vpop.permute.xlu2 %881 }
 0xc76   :  { %885 = vst.msk [vmem:[#allocation12 + $0x8] sm:$0xc0] %vm563_vm2, %v882_v55 }
 0xc77   :  { %886 = vst.msk [vmem:[#allocation2 - $0x6] sm:$0xc0] %vm563_vm2, %v882_v55  ;;  %899 = dma.vmem_to_hbm [thread:$0]  %s892_s20, 256, %s894_s23, [#allocation6], %s1208_s24, %s1208_s24, %s1209_s25  }
 0xc78   :  { %1197 = dma.done.wait [#allocation6], 256  }
 0xc79   :  { %1198 = vsyncadd [#allocation6], 4294967040 }
 0xc7a   :  { %904 = vsyncpa [#allocation5], 1 }
 0xc7b   :  { %905 = vsyncpa [#allocation8], 1 }
 0xc7c   :  { %906 = vsyncpa [#allocation11], 1 }
 0xc7d   :  { %907 = vsyncpa [#allocation6], 1 }

</bundles_post_ra>
